<compile_context>
chip_gen: v7x
topology: tpu7x:2x2x1
jax: 0.10.0
libtpu: 0.0.40
codegen_flags: <defaults>
</compile_context>

<pallas_src>
import functools

import jax
import jax.numpy as jnp
from jax.experimental import pallas as pl
from jax.experimental.pallas import tpu as pltpu

LANE = 128              # lane width / feature-dim padding quantum
SUBLANE = 8             # sublane quantum for the row dimension
MAX_BLOCK_M = 1024      # row-block upper bound
WEIGHT_DTYPE = jnp.bfloat16   # MXU operand dtype; accumulation / VPU math f32


# ----------------------------------------------------------------------------
# small helpers
# ----------------------------------------------------------------------------
def _round_up(x, m):
    return ((x + m - 1) // m) * m


def _plan_rows(m, max_block=MAX_BLOCK_M):
    """Return (Mp, bm): padded row count and row-block size.

    Rows are padded only to a sublane multiple. The block is the largest
    power-of-two <= max_block whose padding waste is <=12.5% and that gives
    at least 2 grid blocks (so both TensorCores on v7x get work).
    """
    m8 = _round_up(max(m, 1), SUBLANE)
    best_mp, best_bm = m8, SUBLANE
    bm = SUBLANE * 2
    while bm <= max_block:
        mp = _round_up(m8, bm)
        if (mp - m8) * 8 <= mp and mp // bm >= 2:
            best_mp, best_bm = mp, bm
        bm *= 2
    return best_mp, best_bm


def _pad2(w, in_pad, out_pad):
    """Place (in,out) weight into a zero (in_pad, out_pad) block (f32)."""
    return jnp.zeros((in_pad, out_pad), jnp.float32).at[
        : w.shape[0], : w.shape[1]].set(w)


def _pad_bias(b, out_pad):
    return jnp.zeros((1, out_pad), jnp.float32).at[0, : b.shape[0]].set(b)


def _mm(h, w):
    """bf16-operand matmul with f32 accumulation (matches in-kernel dots)."""
    return jnp.dot(h.astype(w.dtype), w, preferred_element_type=jnp.float32)


# ----------------------------------------------------------------------------
# the single fused Pallas kernel
# ----------------------------------------------------------------------------
def _cvae_fused_kernel(*refs, n_enc, n_dec, lat_pad):
    """Per row-block: s-branch, z-branch (stacked tgt|bg rows), decoder.

    inputs : tgt(bm,Dp), bg(bm,Dp), eps_s(bm,Lp), eps_zt(bm,Lp), eps_zb(bm,Lp),
             s_enc (w,b)*n_enc, s_head (w,b),
             z_enc (w,b)*n_enc, z_head (w,b),
             dec_first (w1_z, w1_s, b1), dec_rest (w,b)*(n_dec-1)
    outputs: s_mb(bm,2Lp), s_z(bm,Lp), zt_mb(bm,2Lp), zb_mb(bm,2Lp),
             zt_z(bm,Lp), tg_out(bm,Dp_out), bg_out(bm,Dp_out)
    """
    idx = 0

    def take(n):
        nonlocal idx
        out = refs[idx: idx + n]
        idx += n
        return out

    tgt_ref, bg_ref, eps_s_ref, eps_zt_ref, eps_zb_ref = take(5)
    s_enc = take(2 * n_enc)
    s_head = take(2)
    z_enc = take(2 * n_enc)
    z_head = take(2)
    dec_first = take(3)
    dec_rest = take(2 * (n_dec - 1))
    (s_mb_ref, s_z_ref, zt_mb_ref, zb_mb_ref, zt_z_ref,
     tg_out_ref, bg_out_ref) = take(7)

    bm = tgt_ref.shape[0]

    def mlp(h, layers):
        for i in range(n_enc):
            w = layers[2 * i][...]
            b = layers[2 * i + 1][...]
            h = jnp.maximum(
                jnp.dot(h.astype(w.dtype), w,
                        preferred_element_type=jnp.float32) + b, 0.0)
        return h

    def head(h, head_refs):
        w = head_refs[0][...]
        b = head_refs[1][...]
        return jnp.dot(h.astype(w.dtype), w,
                       preferred_element_type=jnp.float32) + b

    # ------------------------- s branch (target rows) ------------------------
    hs = mlp(tgt_ref[...], s_enc)
    s_mb = head(hs, s_head)                                  # (bm, 2*Lp)
    s_mean = s_mb[:, :lat_pad]
    s_logvar = s_mb[:, lat_pad:]
    s_z = s_mean + eps_s_ref[...] * jnp.exp(0.5 * s_logvar)
    s_mb_ref[...] = s_mb
    s_z_ref[...] = s_z

    # -------------- z branch on the row-stacked [target|background] ----------
    hz = mlp(jnp.concatenate([tgt_ref[...], bg_ref[...]], axis=0), z_enc)
    z_mb = head(hz, z_head)                                  # (2*bm, 2*Lp)
    z_mean = z_mb[:, :lat_pad]
    z_logvar = z_mb[:, lat_pad:]
    eps_z = jnp.concatenate([eps_zt_ref[...], eps_zb_ref[...]], axis=0)
    z_z = z_mean + eps_z * jnp.exp(0.5 * z_logvar)
    zt_mb_ref[...] = z_mb[:bm]
    zb_mb_ref[...] = z_mb[bm:]
    zt_z_ref[...] = z_z[:bm]

    # ------------------------ decoder on the stacked rows --------------------
    w1z = dec_first[0][...]
    w1s = dec_first[1][...]
    b1 = dec_first[2][...]
    h = jnp.dot(z_z.astype(w1z.dtype), w1z,
                preferred_element_type=jnp.float32) + b1      # (2*bm, N1p)
    s_contrib = jnp.dot(s_z.astype(w1s.dtype), w1s,
                        preferred_element_type=jnp.float32)   # target half only
    if n_dec == 1:
        h = jnp.concatenate([jax.nn.sigmoid(h[:bm] + s_contrib),
                             jax.nn.sigmoid(h[bm:])], axis=0)
    else:
        h = jnp.concatenate([jnp.maximum(h[:bm] + s_contrib, 0.0),
                             jnp.maximum(h[bm:], 0.0)], axis=0)
        for i in range(n_dec - 1):
            w = dec_rest[2 * i][...]
            b = dec_rest[2 * i + 1][...]
            y = jnp.dot(h.astype(w.dtype), w,
                        preferred_element_type=jnp.float32) + b
            h = jax.nn.sigmoid(y) if i == n_dec - 2 else jnp.maximum(y, 0.0)

    tg_out_ref[...] = h[:bm]
    bg_out_ref[...] = h[bm:]


# ----------------------------------------------------------------------------
# Parameter construction (PyTorch-Linear init, pre-transposed + lane-padded)
# ----------------------------------------------------------------------------
def _init_linear(key, in_f, out_f):
    kw, kb = jax.random.split(key)
    bound = 1.0 / (in_f ** 0.5)
    # PyTorch Linear weight is (out, in); we store W.T = (in, out).
    w = jax.random.uniform(kw, (out_f, in_f), jnp.float32, -bound, bound).T
    b = jax.random.uniform(kb, (out_f,), jnp.float32, -bound, bound)
    return w, b


def make_cvae_params(key, encoder_layer_sizes, latent_size,
                     decoder_layer_sizes, input_size):
    Dp = _round_up(input_size, LANE)
    Lp = _round_up(latent_size, LANE)
    enc_real = [input_size] + list(encoder_layer_sizes)
    enc_pad = [Dp] + [_round_up(s, LANE) for s in encoder_layer_sizes]
    dec_real = [2 * latent_size] + list(decoder_layer_sizes) + [input_size]
    dec_pad = [2 * Lp] + [_round_up(s, LANE) for s in decoder_layer_sizes] + [Dp]

    keys = iter(jax.random.split(key, 64))

    def mlp(real_sizes, pad_sizes):
        out = []
        for (fi, fo), (pi, po) in zip(zip(real_sizes[:-1], real_sizes[1:]),
                                      zip(pad_sizes[:-1], pad_sizes[1:])):
            w, b = _init_linear(next(keys), fi, fo)
            out.append((_pad2(w, pi, po).astype(WEIGHT_DTYPE), _pad_bias(b, po)))
        return out

    params = {
        "s_encoder": mlp(enc_real, enc_pad),
        "z_encoder": mlp(enc_real, enc_pad),
    }

    # fused latent heads: [W_means | W_log_var] -> (h_pad, 2*Lp)
    h_real, h_pad = encoder_layer_sizes[-1], enc_pad[-1]

    def head(km, kv):
        wm, bmn = _init_linear(km, h_real, latent_size)
        wv, bv = _init_linear(kv, h_real, latent_size)
        w = jnp.concatenate([_pad2(wm, h_pad, Lp), _pad2(wv, h_pad, Lp)], axis=1)
        b = jnp.concatenate([_pad_bias(bmn, Lp), _pad_bias(bv, Lp)], axis=1)
        return w.astype(WEIGHT_DTYPE), b

    params["s_head"] = head(next(keys), next(keys))
    params["z_head"] = head(next(keys), next(keys))

    # decoder: first-layer weight split into the z rows and the s rows so the
    # kernel never builds a [z|s] lane concat or a zero background half.
    w1, b1 = _init_linear(next(keys), dec_real[0], dec_real[1])   # (2L, N1)
    N1p = dec_pad[1]
    w1_z = _pad2(w1[:latent_size], Lp, N1p).astype(WEIGHT_DTYPE)
    w1_s = _pad2(w1[latent_size:], Lp, N1p).astype(WEIGHT_DTYPE)
    params["dec_first"] = (w1_z, w1_s, _pad_bias(b1, N1p))

    rest = []
    for idx in range(1, len(dec_real) - 1):
        w, b = _init_linear(next(keys), dec_real[idx], dec_real[idx + 1])
        rest.append((_pad2(w, dec_pad[idx], dec_pad[idx + 1]).astype(WEIGHT_DTYPE),
                     _pad_bias(b, dec_pad[idx + 1])))
    params["dec_rest"] = rest
    return params


# ----------------------------------------------------------------------------
# Forward pass
# ----------------------------------------------------------------------------
def _prepare(params, target, background, eps_key, latent_size):
    B, T, D = target.shape
    M = B * T
    Dp = params["s_encoder"][0][0].shape[0]
    Lp = params["s_head"][0].shape[1] // 2
    Dp_out = (params["dec_rest"][-1][0].shape[1] if params["dec_rest"]
              else params["dec_first"][0].shape[1])
    Mp, bm = _plan_rows(M)

    def pad_x(x):
        x2 = x.reshape(M, D).astype(jnp.float32)
        return jnp.zeros((Mp, Dp), jnp.float32).at[:M, :D].set(x2)

    def eps(k):
        # pad lanes stay exactly zero -> padded lanes of the latents are zero.
        e = jax.random.normal(k, (Mp, latent_size), jnp.float32)
        return jnp.zeros((Mp, Lp), jnp.float32).at[:, :latent_size].set(e)

    ks, kzt, kzb = jax.random.split(eps_key, 3)
    meta = (B, T, D, M, Mp, bm, Dp, Lp, Dp_out)
    return meta, pad_x(target), pad_x(background), eps(ks), eps(kzt), eps(kzb)


def _pack_outputs(B, T, D, L, M, Lp, outs):
    s_mb, s_z, zt_mb, zb_mb, zt_z, tg_out, bg_out = outs

    def crop(x, n):
        return x[:M, :n].reshape(B, T, n)

    def crop_lv(x):  # log_var lives in lanes [Lp : Lp+L] of the fused head out
        return x[:M, Lp:Lp + L].reshape(B, T, L)

    return {
        "target": crop(tg_out, D),
        "tg_qs_mean": crop(s_mb, L),
        "tg_qs_log_var": crop_lv(s_mb),
        "tg_qz_mean": crop(zt_mb, L),
        "tg_qz_log_var": crop_lv(zt_mb),
        "background": crop(bg_out, D),
        "bg_qz_mean": crop(zb_mb, L),
        "bg_qz_log_var": crop_lv(zb_mb),
        "latent_qs_target": crop(s_z, L),
        "latent_qz_target": crop(zt_z, L),
    }


def cvae_forward(params, target, background, eps_key, *, latent_size):
    meta, tgt_p, bg_p, eps_s, eps_zt, eps_zb = _prepare(
        params, target, background, eps_key, latent_size)
    B, T, D, M, Mp, bm, Dp, Lp, Dp_out = meta
    n_enc = len(params["s_encoder"])
    n_dec = 1 + len(params["dec_rest"])

    weights = []
    for w, b in params["s_encoder"]:
        weights += [w, b]
    weights += list(params["s_head"])
    for w, b in params["z_encoder"]:
        weights += [w, b]
    weights += list(params["z_head"])
    weights += list(params["dec_first"])
    for w, b in params["dec_rest"]:
        weights += [w, b]

    def row_spec(cols):
        return pl.BlockSpec((bm, cols), lambda i: (i, 0))

    in_specs = [row_spec(Dp), row_spec(Dp),
                row_spec(Lp), row_spec(Lp), row_spec(Lp)]
    in_specs += [pl.BlockSpec(w.shape, lambda i: (0, 0)) for w in weights]

    out_specs = [row_spec(2 * Lp), row_spec(Lp), row_spec(2 * Lp),
                 row_spec(2 * Lp), row_spec(Lp),
                 row_spec(Dp_out), row_spec(Dp_out)]
    out_shape = [jax.ShapeDtypeStruct((Mp, 2 * Lp), jnp.float32),
                 jax.ShapeDtypeStruct((Mp, Lp), jnp.float32),
                 jax.ShapeDtypeStruct((Mp, 2 * Lp), jnp.float32),
                 jax.ShapeDtypeStruct((Mp, 2 * Lp), jnp.float32),
                 jax.ShapeDtypeStruct((Mp, Lp), jnp.float32),
                 jax.ShapeDtypeStruct((Mp, Dp_out), jnp.float32),
                 jax.ShapeDtypeStruct((Mp, Dp_out), jnp.float32)]

    kernel = functools.partial(_cvae_fused_kernel,
                               n_enc=n_enc, n_dec=n_dec, lat_pad=Lp)

    outs = pl.pallas_call(
        kernel,
        grid=(Mp // bm,),
        in_specs=in_specs,
        out_specs=out_specs,
        out_shape=out_shape,
        compiler_params=pltpu.CompilerParams(
            dimension_semantics=("parallel",)),
    )(tgt_p, bg_p, eps_s, eps_zt, eps_zb, *weights)

    return _pack_outputs(B, T, D, latent_size, M, Lp, outs)


# Pure-JAX reference (same padded params / eps / bf16 operands).
def cvae_forward_ref(params, target, background, eps_key, *, latent_size):
    meta, tgt_p, bg_p, eps_s, eps_zt, eps_zb = _prepare(
        params, target, background, eps_key, latent_size)
    B, T, D, M, Mp, bm, Dp, Lp, Dp_out = meta

    def mlp(h, layers):
        for w, b in layers:
            h = jnp.maximum(_mm(h, w) + b, 0.0)
        return h

    hs = mlp(tgt_p, params["s_encoder"])
    s_mb = _mm(hs, params["s_head"][0]) + params["s_head"][1]
    s_z = s_mb[:, :Lp] + eps_s * jnp.exp(0.5 * s_mb[:, Lp:])

    hz = mlp(jnp.concatenate([tgt_p, bg_p], axis=0), params["z_encoder"])
    z_mb = _mm(hz, params["z_head"][0]) + params["z_head"][1]
    eps_z = jnp.concatenate([eps_zt, eps_zb], axis=0)
    z_z = z_mb[:, :Lp] + eps_z * jnp.exp(0.5 * z_mb[:, Lp:])

    w1z, w1s, b1 = params["dec_first"]
    h = _mm(z_z, w1z) + b1
    s_contrib = _mm(s_z, w1s)
    n_rest = len(params["dec_rest"])
    if n_rest == 0:
        h = jnp.concatenate([jax.nn.sigmoid(h[:Mp] + s_contrib),
                             jax.nn.sigmoid(h[Mp:])], axis=0)
    else:
        h = jnp.concatenate([jnp.maximum(h[:Mp] + s_contrib, 0.0),
                             jnp.maximum(h[Mp:], 0.0)], axis=0)
        for i, (w, b) in enumerate(params["dec_rest"]):
            y = _mm(h, w) + b
            h = jax.nn.sigmoid(y) if i == n_rest - 1 else jnp.maximum(y, 0.0)

    outs = (s_mb, s_z, z_mb[:Mp], z_mb[Mp:], z_z[:Mp], h[:Mp], h[Mp:])
    return _pack_outputs(B, T, D, latent_size, M, Lp, outs)


# ----------------------------------------------------------------------------
if __name__ == "__main__":
    # Small, module-consistent configuration.
    B, T = 2, 8
    input_size = 32
    encoder_layer_sizes = [32, 16]
    latent_size = 8
    decoder_layer_sizes = [16, 32]

    root = jax.random.PRNGKey(0)
    kp, kt, kb, ke = jax.random.split(root, 4)

    params = make_cvae_params(kp, encoder_layer_sizes, latent_size,
                              decoder_layer_sizes, input_size)
    target = jax.random.normal(kt, (B, T, input_size), jnp.float32)
    background = jax.random.normal(kb, (B, T, input_size), jnp.float32)

    fwd = jax.jit(cvae_forward, static_argnames=("latent_size",))
    out = fwd(params, target, background, ke, latent_size=latent_size)
    jax.block_until_ready(out)

    ref_fn = jax.jit(cvae_forward_ref, static_argnames=("latent_size",))
    ref = ref_fn(params, target, background, ke, latent_size=latent_size)
    jax.block_until_ready(ref)

    # Shape sanity (matches PyTorch semantics).
    assert out["target"].shape == (B, T, input_size)
    assert out["background"].shape == (B, T, input_size)
    assert out["tg_qs_mean"].shape == (B, T, latent_size)
    assert out["bg_qz_log_var"].shape == (B, T, latent_size)
    assert out["latent_qz_target"].shape == (B, T, latent_size)

    # Numerical sanity vs pure-JAX reference (same params / eps / bf16 dots).
    for k in out:
        err = float(jnp.max(jnp.abs(out[k] - ref[k])))
        assert err < 2e-2, f"{k}: max |diff| = {err}"

    print("KERNEL_OK")
</pallas_src>

<mosaic_0001>
module attributes {stable_mosaic.version = 11 : i64} {
  func.func @_cvae_fused_kernel(%arg0: i32, %arg1: memref<8x128xf32, #tpu.memory_space<vmem>>, %arg2: memref<8x128xf32, #tpu.memory_space<vmem>>, %arg3: memref<8x128xf32, #tpu.memory_space<vmem>>, %arg4: memref<8x128xf32, #tpu.memory_space<vmem>>, %arg5: memref<8x128xf32, #tpu.memory_space<vmem>>, %arg6: memref<128x128xbf16, #tpu.memory_space<vmem>>, %arg7: memref<1x128xf32, #tpu.memory_space<vmem>>, %arg8: memref<128x128xbf16, #tpu.memory_space<vmem>>, %arg9: memref<1x128xf32, #tpu.memory_space<vmem>>, %arg10: memref<128x256xbf16, #tpu.memory_space<vmem>>, %arg11: memref<1x256xf32, #tpu.memory_space<vmem>>, %arg12: memref<128x128xbf16, #tpu.memory_space<vmem>>, %arg13: memref<1x128xf32, #tpu.memory_space<vmem>>, %arg14: memref<128x128xbf16, #tpu.memory_space<vmem>>, %arg15: memref<1x128xf32, #tpu.memory_space<vmem>>, %arg16: memref<128x256xbf16, #tpu.memory_space<vmem>>, %arg17: memref<1x256xf32, #tpu.memory_space<vmem>>, %arg18: memref<128x128xbf16, #tpu.memory_space<vmem>>, %arg19: memref<128x128xbf16, #tpu.memory_space<vmem>>, %arg20: memref<1x128xf32, #tpu.memory_space<vmem>>, %arg21: memref<128x128xbf16, #tpu.memory_space<vmem>>, %arg22: memref<1x128xf32, #tpu.memory_space<vmem>>, %arg23: memref<128x128xbf16, #tpu.memory_space<vmem>>, %arg24: memref<1x128xf32, #tpu.memory_space<vmem>>, %arg25: memref<8x256xf32, #tpu.memory_space<vmem>>, %arg26: memref<8x128xf32, #tpu.memory_space<vmem>>, %arg27: memref<8x256xf32, #tpu.memory_space<vmem>>, %arg28: memref<8x256xf32, #tpu.memory_space<vmem>>, %arg29: memref<8x128xf32, #tpu.memory_space<vmem>>, %arg30: memref<8x128xf32, #tpu.memory_space<vmem>>, %arg31: memref<8x128xf32, #tpu.memory_space<vmem>>) attributes {dimension_semantics = [#tpu.dimension_semantics<parallel>], iteration_bounds = array<i64: 2>, scalar_prefetch = 0 : i64, scratch_operands = 0 : i64, tpu.core_type = #tpu.core_type<tc>, window_params = [{transform_indices = @transform_0, window_bounds = array<i64: 8, 128>}, {transform_indices = @transform_1, window_bounds = array<i64: 8, 128>}, {transform_indices = @transform_2, window_bounds = array<i64: 8, 128>}, {transform_indices = @transform_3, window_bounds = array<i64: 8, 128>}, {transform_indices = @transform_4, window_bounds = array<i64: 8, 128>}, {pipeline_mode = #tpu.pipeline_mode<synchronous>, transform_indices = @transform_5, window_bounds = array<i64: 128, 128>}, {pipeline_mode = #tpu.pipeline_mode<synchronous>, transform_indices = @transform_6, window_bounds = array<i64: 1, 128>}, {pipeline_mode = #tpu.pipeline_mode<synchronous>, transform_indices = @transform_7, window_bounds = array<i64: 128, 128>}, {pipeline_mode = #tpu.pipeline_mode<synchronous>, transform_indices = @transform_8, window_bounds = array<i64: 1, 128>}, {pipeline_mode = #tpu.pipeline_mode<synchronous>, transform_indices = @transform_9, window_bounds = array<i64: 128, 256>}, {pipeline_mode = #tpu.pipeline_mode<synchronous>, transform_indices = @transform_10, window_bounds = array<i64: 1, 256>}, {pipeline_mode = #tpu.pipeline_mode<synchronous>, transform_indices = @transform_11, window_bounds = array<i64: 128, 128>}, {pipeline_mode = #tpu.pipeline_mode<synchronous>, transform_indices = @transform_12, window_bounds = array<i64: 1, 128>}, {pipeline_mode = #tpu.pipeline_mode<synchronous>, transform_indices = @transform_13, window_bounds = array<i64: 128, 128>}, {pipeline_mode = #tpu.pipeline_mode<synchronous>, transform_indices = @transform_14, window_bounds = array<i64: 1, 128>}, {pipeline_mode = #tpu.pipeline_mode<synchronous>, transform_indices = @transform_15, window_bounds = array<i64: 128, 256>}, {pipeline_mode = #tpu.pipeline_mode<synchronous>, transform_indices = @transform_16, window_bounds = array<i64: 1, 256>}, {pipeline_mode = #tpu.pipeline_mode<synchronous>, transform_indices = @transform_17, window_bounds = array<i64: 128, 128>}, {pipeline_mode = #tpu.pipeline_mode<synchronous>, transform_indices = @transform_18, window_bounds = array<i64: 128, 128>}, {pipeline_mode = #tpu.pipeline_mode<synchronous>, transform_indices = @transform_19, window_bounds = array<i64: 1, 128>}, {pipeline_mode = #tpu.pipeline_mode<synchronous>, transform_indices = @transform_20, window_bounds = array<i64: 128, 128>}, {pipeline_mode = #tpu.pipeline_mode<synchronous>, transform_indices = @transform_21, window_bounds = array<i64: 1, 128>}, {pipeline_mode = #tpu.pipeline_mode<synchronous>, transform_indices = @transform_22, window_bounds = array<i64: 128, 128>}, {pipeline_mode = #tpu.pipeline_mode<synchronous>, transform_indices = @transform_23, window_bounds = array<i64: 1, 128>}, {transform_indices = @transform_24, window_bounds = array<i64: 8, 256>}, {transform_indices = @transform_25, window_bounds = array<i64: 8, 128>}, {transform_indices = @transform_26, window_bounds = array<i64: 8, 256>}, {transform_indices = @transform_27, window_bounds = array<i64: 8, 256>}, {transform_indices = @transform_28, window_bounds = array<i64: 8, 128>}, {transform_indices = @transform_29, window_bounds = array<i64: 8, 128>}, {transform_indices = @transform_30, window_bounds = array<i64: 8, 128>}]} {
    %c0 = arith.constant 0 : index
    %c0_0 = arith.constant 0 : index
    %0 = vector.load %arg1[%c0, %c0_0] : memref<8x128xf32, #tpu.memory_space<vmem>>, vector<8x128xf32>
    %c0_1 = arith.constant 0 : index
    %c0_2 = arith.constant 0 : index
    %1 = vector.load %arg6[%c0_1, %c0_2] : memref<128x128xbf16, #tpu.memory_space<vmem>>, vector<128x128xbf16>
    %c0_3 = arith.constant 0 : index
    %c0_4 = arith.constant 0 : index
    %2 = vector.load %arg7[%c0_3, %c0_4] : memref<1x128xf32, #tpu.memory_space<vmem>>, vector<1x128xf32>
    %3 = arith.truncf %0 : vector<8x128xf32> to vector<8x128xbf16>
    %cst = arith.constant dense<0.000000e+00> : vector<8x128xf32>
    %4 = tpu.matmul %3, %1, %cst {dimension_numbers = #tpu.dot_dimension_numbers<[1], [0], [0], [1], [0, 0, 1, 1], [], []>} : vector<8x128xbf16>, vector<128x128xbf16>, vector<8x128xf32> -> vector<8x128xf32>
    %5 = vector.broadcast %2 : vector<1x128xf32> to vector<8x128xf32>
    %6 = arith.addf %4, %5 : vector<8x128xf32>
    %cst_5 = arith.constant 0.000000e+00 : f32
    %7 = vector.broadcast %cst_5 : f32 to vector<8x128xf32>
    %8 = arith.maximumf %6, %7 : vector<8x128xf32>
    %c0_6 = arith.constant 0 : index
    %c0_7 = arith.constant 0 : index
    %9 = vector.load %arg8[%c0_6, %c0_7] : memref<128x128xbf16, #tpu.memory_space<vmem>>, vector<128x128xbf16>
    %c0_8 = arith.constant 0 : index
    %c0_9 = arith.constant 0 : index
    %10 = vector.load %arg9[%c0_8, %c0_9] : memref<1x128xf32, #tpu.memory_space<vmem>>, vector<1x128xf32>
    %11 = arith.truncf %8 : vector<8x128xf32> to vector<8x128xbf16>
    %cst_10 = arith.constant dense<0.000000e+00> : vector<8x128xf32>
    %12 = tpu.matmul %11, %9, %cst_10 {dimension_numbers = #tpu.dot_dimension_numbers<[1], [0], [0], [1], [0, 0, 1, 1], [], []>} : vector<8x128xbf16>, vector<128x128xbf16>, vector<8x128xf32> -> vector<8x128xf32>
    %13 = vector.broadcast %10 : vector<1x128xf32> to vector<8x128xf32>
    %14 = arith.addf %12, %13 : vector<8x128xf32>
    %cst_11 = arith.constant 0.000000e+00 : f32
    %15 = vector.broadcast %cst_11 : f32 to vector<8x128xf32>
    %16 = arith.maximumf %14, %15 : vector<8x128xf32>
    %c0_12 = arith.constant 0 : index
    %c0_13 = arith.constant 0 : index
    %17 = vector.load %arg10[%c0_12, %c0_13] : memref<128x256xbf16, #tpu.memory_space<vmem>>, vector<128x256xbf16>
    %c0_14 = arith.constant 0 : index
    %c0_15 = arith.constant 0 : index
    %18 = vector.load %arg11[%c0_14, %c0_15] : memref<1x256xf32, #tpu.memory_space<vmem>>, vector<1x256xf32>
    %19 = arith.truncf %16 : vector<8x128xf32> to vector<8x128xbf16>
    %cst_16 = arith.constant dense<0.000000e+00> : vector<8x256xf32>
    %20 = tpu.matmul %19, %17, %cst_16 {dimension_numbers = #tpu.dot_dimension_numbers<[1], [0], [0], [1], [0, 0, 1, 1], [], []>} : vector<8x128xbf16>, vector<128x256xbf16>, vector<8x256xf32> -> vector<8x256xf32>
    %21 = vector.broadcast %18 : vector<1x256xf32> to vector<8x256xf32>
    %22 = arith.addf %20, %21 : vector<8x256xf32>
    %23 = vector.extract_strided_slice %22 {offsets = [0, 0], sizes = [8, 128], strides = [1, 1]} : vector<8x256xf32> to vector<8x128xf32>
    %24 = vector.extract_strided_slice %22 {offsets = [0, 128], sizes = [8, 128], strides = [1, 1]} : vector<8x256xf32> to vector<8x128xf32>
    %c0_17 = arith.constant 0 : index
    %c0_18 = arith.constant 0 : index
    %25 = vector.load %arg3[%c0_17, %c0_18] : memref<8x128xf32, #tpu.memory_space<vmem>>, vector<8x128xf32>
    %cst_19 = arith.constant 5.000000e-01 : f32
    %26 = vector.broadcast %cst_19 : f32 to vector<8x128xf32>
    %27 = arith.mulf %26, %24 : vector<8x128xf32>
    %28 = math.exp %27 : vector<8x128xf32>
    %29 = arith.mulf %25, %28 : vector<8x128xf32>
    %30 = arith.addf %23, %29 : vector<8x128xf32>
    %c0_20 = arith.constant 0 : index
    %c0_21 = arith.constant 0 : index
    %31 = vector.load %arg25[%c0_20, %c0_21] : memref<8x256xf32, #tpu.memory_space<vmem>>, vector<8x256xf32>
    tpu.vector_store %arg25[%c0_20, %c0_21], %22 {strides = array<i32>} : memref<8x256xf32, #tpu.memory_space<vmem>>, vector<8x256xf32>,
    %c0_22 = arith.constant 0 : index
    %c0_23 = arith.constant 0 : index
    %32 = vector.load %arg26[%c0_22, %c0_23] : memref<8x128xf32, #tpu.memory_space<vmem>>, vector<8x128xf32>
    tpu.vector_store %arg26[%c0_22, %c0_23], %30 {strides = array<i32>} : memref<8x128xf32, #tpu.memory_space<vmem>>, vector<8x128xf32>,
    %c0_24 = arith.constant 0 : index
    %c0_25 = arith.constant 0 : index
    %33 = vector.load %arg1[%c0_24, %c0_25] : memref<8x128xf32, #tpu.memory_space<vmem>>, vector<8x128xf32>
    %c0_26 = arith.constant 0 : index
    %c0_27 = arith.constant 0 : index
    %34 = vector.load %arg2[%c0_26, %c0_27] : memref<8x128xf32, #tpu.memory_space<vmem>>, vector<8x128xf32>
    %35 = tpu.concatenate %33, %34 in 0 : vector<8x128xf32>, vector<8x128xf32> -> vector<16x128xf32>
    %c0_28 = arith.constant 0 : index
    %c0_29 = arith.constant 0 : index
    %36 = vector.load %arg12[%c0_28, %c0_29] : memref<128x128xbf16, #tpu.memory_space<vmem>>, vector<128x128xbf16>
    %c0_30 = arith.constant 0 : index
    %c0_31 = arith.constant 0 : index
    %37 = vector.load %arg13[%c0_30, %c0_31] : memref<1x128xf32, #tpu.memory_space<vmem>>, vector<1x128xf32>
    %38 = arith.truncf %35 : vector<16x128xf32> to vector<16x128xbf16>
    %cst_32 = arith.constant dense<0.000000e+00> : vector<16x128xf32>
    %39 = tpu.matmul %38, %36, %cst_32 {dimension_numbers = #tpu.dot_dimension_numbers<[1], [0], [0], [1], [0, 0, 1, 1], [], []>} : vector<16x128xbf16>, vector<128x128xbf16>, vector<16x128xf32> -> vector<16x128xf32>
    %40 = vector.broadcast %37 : vector<1x128xf32> to vector<16x128xf32>
    %41 = arith.addf %39, %40 : vector<16x128xf32>
    %cst_33 = arith.constant 0.000000e+00 : f32
    %42 = vector.broadcast %cst_33 : f32 to vector<16x128xf32>
    %43 = arith.maximumf %41, %42 : vector<16x128xf32>
    %c0_34 = arith.constant 0 : index
    %c0_35 = arith.constant 0 : index
    %44 = vector.load %arg14[%c0_34, %c0_35] : memref<128x128xbf16, #tpu.memory_space<vmem>>, vector<128x128xbf16>
    %c0_36 = arith.constant 0 : index
    %c0_37 = arith.constant 0 : index
    %45 = vector.load %arg15[%c0_36, %c0_37] : memref<1x128xf32, #tpu.memory_space<vmem>>, vector<1x128xf32>
    %46 = arith.truncf %43 : vector<16x128xf32> to vector<16x128xbf16>
    %cst_38 = arith.constant dense<0.000000e+00> : vector<16x128xf32>
    %47 = tpu.matmul %46, %44, %cst_38 {dimension_numbers = #tpu.dot_dimension_numbers<[1], [0], [0], [1], [0, 0, 1, 1], [], []>} : vector<16x128xbf16>, vector<128x128xbf16>, vector<16x128xf32> -> vector<16x128xf32>
    %48 = vector.broadcast %45 : vector<1x128xf32> to vector<16x128xf32>
    %49 = arith.addf %47, %48 : vector<16x128xf32>
    %cst_39 = arith.constant 0.000000e+00 : f32
    %50 = vector.broadcast %cst_39 : f32 to vector<16x128xf32>
    %51 = arith.maximumf %49, %50 : vector<16x128xf32>
    %c0_40 = arith.constant 0 : index
    %c0_41 = arith.constant 0 : index
    %52 = vector.load %arg16[%c0_40, %c0_41] : memref<128x256xbf16, #tpu.memory_space<vmem>>, vector<128x256xbf16>
    %c0_42 = arith.constant 0 : index
    %c0_43 = arith.constant 0 : index
    %53 = vector.load %arg17[%c0_42, %c0_43] : memref<1x256xf32, #tpu.memory_space<vmem>>, vector<1x256xf32>
    %54 = arith.truncf %51 : vector<16x128xf32> to vector<16x128xbf16>
    %cst_44 = arith.constant dense<0.000000e+00> : vector<16x256xf32>
    %55 = tpu.matmul %54, %52, %cst_44 {dimension_numbers = #tpu.dot_dimension_numbers<[1], [0], [0], [1], [0, 0, 1, 1], [], []>} : vector<16x128xbf16>, vector<128x256xbf16>, vector<16x256xf32> -> vector<16x256xf32>
    %56 = vector.broadcast %53 : vector<1x256xf32> to vector<16x256xf32>
    %57 = arith.addf %55, %56 : vector<16x256xf32>
    %58 = vector.extract_strided_slice %57 {offsets = [0, 0], sizes = [16, 128], strides = [1, 1]} : vector<16x256xf32> to vector<16x128xf32>
    %59 = vector.extract_strided_slice %57 {offsets = [0, 128], sizes = [16, 128], strides = [1, 1]} : vector<16x256xf32> to vector<16x128xf32>
    %c0_45 = arith.constant 0 : index
    %c0_46 = arith.constant 0 : index
    %60 = vector.load %arg4[%c0_45, %c0_46] : memref<8x128xf32, #tpu.memory_space<vmem>>, vector<8x128xf32>
    %c0_47 = arith.constant 0 : index
    %c0_48 = arith.constant 0 : index
    %61 = vector.load %arg5[%c0_47, %c0_48] : memref<8x128xf32, #tpu.memory_space<vmem>>, vector<8x128xf32>
    %62 = tpu.concatenate %60, %61 in 0 : vector<8x128xf32>, vector<8x128xf32> -> vector<16x128xf32>
    %cst_49 = arith.constant 5.000000e-01 : f32
    %63 = vector.broadcast %cst_49 : f32 to vector<16x128xf32>
    %64 = arith.mulf %63, %59 : vector<16x128xf32>
    %65 = math.exp %64 : vector<16x128xf32>
    %66 = arith.mulf %62, %65 : vector<16x128xf32>
    %67 = arith.addf %58, %66 : vector<16x128xf32>
    %68 = vector.extract_strided_slice %57 {offsets = [0, 0], sizes = [8, 256], strides = [1, 1]} : vector<16x256xf32> to vector<8x256xf32>
    %c0_50 = arith.constant 0 : index
    %c0_51 = arith.constant 0 : index
    %69 = vector.load %arg27[%c0_50, %c0_51] : memref<8x256xf32, #tpu.memory_space<vmem>>, vector<8x256xf32>
    tpu.vector_store %arg27[%c0_50, %c0_51], %68 {strides = array<i32>} : memref<8x256xf32, #tpu.memory_space<vmem>>, vector<8x256xf32>,
    %70 = vector.extract_strided_slice %57 {offsets = [8, 0], sizes = [8, 256], strides = [1, 1]} : vector<16x256xf32> to vector<8x256xf32>
    %c0_52 = arith.constant 0 : index
    %c0_53 = arith.constant 0 : index
    %71 = vector.load %arg28[%c0_52, %c0_53] : memref<8x256xf32, #tpu.memory_space<vmem>>, vector<8x256xf32>
    tpu.vector_store %arg28[%c0_52, %c0_53], %70 {strides = array<i32>} : memref<8x256xf32, #tpu.memory_space<vmem>>, vector<8x256xf32>,
    %72 = vector.extract_strided_slice %67 {offsets = [0, 0], sizes = [8, 128], strides = [1, 1]} : vector<16x128xf32> to vector<8x128xf32>
    %c0_54 = arith.constant 0 : index
    %c0_55 = arith.constant 0 : index
    %73 = vector.load %arg29[%c0_54, %c0_55] : memref<8x128xf32, #tpu.memory_space<vmem>>, vector<8x128xf32>
    tpu.vector_store %arg29[%c0_54, %c0_55], %72 {strides = array<i32>} : memref<8x128xf32, #tpu.memory_space<vmem>>, vector<8x128xf32>,
    %c0_56 = arith.constant 0 : index
    %c0_57 = arith.constant 0 : index
    %74 = vector.load %arg18[%c0_56, %c0_57] : memref<128x128xbf16, #tpu.memory_space<vmem>>, vector<128x128xbf16>
    %c0_58 = arith.constant 0 : index
    %c0_59 = arith.constant 0 : index
    %75 = vector.load %arg19[%c0_58, %c0_59] : memref<128x128xbf16, #tpu.memory_space<vmem>>, vector<128x128xbf16>
    %c0_60 = arith.constant 0 : index
    %c0_61 = arith.constant 0 : index
    %76 = vector.load %arg20[%c0_60, %c0_61] : memref<1x128xf32, #tpu.memory_space<vmem>>, vector<1x128xf32>
    %77 = arith.truncf %67 : vector<16x128xf32> to vector<16x128xbf16>
    %cst_62 = arith.constant dense<0.000000e+00> : vector<16x128xf32>
    %78 = tpu.matmul %77, %74, %cst_62 {dimension_numbers = #tpu.dot_dimension_numbers<[1], [0], [0], [1], [0, 0, 1, 1], [], []>} : vector<16x128xbf16>, vector<128x128xbf16>, vector<16x128xf32> -> vector<16x128xf32>
    %79 = vector.broadcast %76 : vector<1x128xf32> to vector<16x128xf32>
    %80 = arith.addf %78, %79 : vector<16x128xf32>
    %81 = arith.truncf %30 : vector<8x128xf32> to vector<8x128xbf16>
    %cst_63 = arith.constant dense<0.000000e+00> : vector<8x128xf32>
    %82 = tpu.matmul %81, %75, %cst_63 {dimension_numbers = #tpu.dot_dimension_numbers<[1], [0], [0], [1], [0, 0, 1, 1], [], []>} : vector<8x128xbf16>, vector<128x128xbf16>, vector<8x128xf32> -> vector<8x128xf32>
    %83 = vector.extract_strided_slice %80 {offsets = [0, 0], sizes = [8, 128], strides = [1, 1]} : vector<16x128xf32> to vector<8x128xf32>
    %84 = arith.addf %83, %82 : vector<8x128xf32>
    %cst_64 = arith.constant 0.000000e+00 : f32
    %85 = vector.broadcast %cst_64 : f32 to vector<8x128xf32>
    %86 = arith.maximumf %84, %85 : vector<8x128xf32>
    %87 = vector.extract_strided_slice %80 {offsets = [8, 0], sizes = [8, 128], strides = [1, 1]} : vector<16x128xf32> to vector<8x128xf32>
    %cst_65 = arith.constant 0.000000e+00 : f32
    %88 = vector.broadcast %cst_65 : f32 to vector<8x128xf32>
    %89 = arith.maximumf %87, %88 : vector<8x128xf32>
    %90 = tpu.concatenate %86, %89 in 0 : vector<8x128xf32>, vector<8x128xf32> -> vector<16x128xf32>
    %c0_66 = arith.constant 0 : index
    %c0_67 = arith.constant 0 : index
    %91 = vector.load %arg21[%c0_66, %c0_67] : memref<128x128xbf16, #tpu.memory_space<vmem>>, vector<128x128xbf16>
    %c0_68 = arith.constant 0 : index
    %c0_69 = arith.constant 0 : index
    %92 = vector.load %arg22[%c0_68, %c0_69] : memref<1x128xf32, #tpu.memory_space<vmem>>, vector<1x128xf32>
    %93 = arith.truncf %90 : vector<16x128xf32> to vector<16x128xbf16>
    %cst_70 = arith.constant dense<0.000000e+00> : vector<16x128xf32>
    %94 = tpu.matmul %93, %91, %cst_70 {dimension_numbers = #tpu.dot_dimension_numbers<[1], [0], [0], [1], [0, 0, 1, 1], [], []>} : vector<16x128xbf16>, vector<128x128xbf16>, vector<16x128xf32> -> vector<16x128xf32>
    %95 = vector.broadcast %92 : vector<1x128xf32> to vector<16x128xf32>
    %96 = arith.addf %94, %95 : vector<16x128xf32>
    %cst_71 = arith.constant 0.000000e+00 : f32
    %97 = vector.broadcast %cst_71 : f32 to vector<16x128xf32>
    %98 = arith.maximumf %96, %97 : vector<16x128xf32>
    %c0_72 = arith.constant 0 : index
    %c0_73 = arith.constant 0 : index
    %99 = vector.load %arg23[%c0_72, %c0_73] : memref<128x128xbf16, #tpu.memory_space<vmem>>, vector<128x128xbf16>
    %c0_74 = arith.constant 0 : index
    %c0_75 = arith.constant 0 : index
    %100 = vector.load %arg24[%c0_74, %c0_75] : memref<1x128xf32, #tpu.memory_space<vmem>>, vector<1x128xf32>
    %101 = arith.truncf %98 : vector<16x128xf32> to vector<16x128xbf16>
    %cst_76 = arith.constant dense<0.000000e+00> : vector<16x128xf32>
    %102 = tpu.matmul %101, %99, %cst_76 {dimension_numbers = #tpu.dot_dimension_numbers<[1], [0], [0], [1], [0, 0, 1, 1], [], []>} : vector<16x128xbf16>, vector<128x128xbf16>, vector<16x128xf32> -> vector<16x128xf32>
    %103 = vector.broadcast %100 : vector<1x128xf32> to vector<16x128xf32>
    %104 = arith.addf %102, %103 : vector<16x128xf32>
    %105 = arith.negf %104 : vector<16x128xf32>
    %106 = math.exp %105 : vector<16x128xf32>
    %cst_77 = arith.constant 1.000000e+00 : f32
    %107 = vector.broadcast %cst_77 : f32 to vector<16x128xf32>
    %108 = arith.addf %107, %106 : vector<16x128xf32>
    %109 = arith.divf %107, %108 : vector<16x128xf32>
    %110 = vector.extract_strided_slice %109 {offsets = [0, 0], sizes = [8, 128], strides = [1, 1]} : vector<16x128xf32> to vector<8x128xf32>
    %c0_78 = arith.constant 0 : index
    %c0_79 = arith.constant 0 : index
    %111 = vector.load %arg30[%c0_78, %c0_79] : memref<8x128xf32, #tpu.memory_space<vmem>>, vector<8x128xf32>
    tpu.vector_store %arg30[%c0_78, %c0_79], %110 {strides = array<i32>} : memref<8x128xf32, #tpu.memory_space<vmem>>, vector<8x128xf32>,
    %112 = vector.extract_strided_slice %109 {offsets = [8, 0], sizes = [8, 128], strides = [1, 1]} : vector<16x128xf32> to vector<8x128xf32>
    %c0_80 = arith.constant 0 : index
    %c0_81 = arith.constant 0 : index
    %113 = vector.load %arg31[%c0_80, %c0_81] : memref<8x128xf32, #tpu.memory_space<vmem>>, vector<8x128xf32>
    tpu.vector_store %arg31[%c0_80, %c0_81], %112 {strides = array<i32>} : memref<8x128xf32, #tpu.memory_space<vmem>>, vector<8x128xf32>,
    return
  }
  func.func @transform_0(%arg0: i32) -> (i32, i32) {
    %c0_i32 = arith.constant 0 : i32
    %c0_i32_0 = arith.constant 0 : i32
    return %arg0, %c0_i32 : i32, i32
  }
  func.func @transform_1(%arg0: i32) -> (i32, i32) {
    %c0_i32 = arith.constant 0 : i32
    %c0_i32_0 = arith.constant 0 : i32
    return %arg0, %c0_i32 : i32, i32
  }
  func.func @transform_2(%arg0: i32) -> (i32, i32) {
    %c0_i32 = arith.constant 0 : i32
    %c0_i32_0 = arith.constant 0 : i32
    return %arg0, %c0_i32 : i32, i32
  }
  func.func @transform_3(%arg0: i32) -> (i32, i32) {
    %c0_i32 = arith.constant 0 : i32
    %c0_i32_0 = arith.constant 0 : i32
    return %arg0, %c0_i32 : i32, i32
  }
  func.func @transform_4(%arg0: i32) -> (i32, i32) {
    %c0_i32 = arith.constant 0 : i32
    %c0_i32_0 = arith.constant 0 : i32
    return %arg0, %c0_i32 : i32, i32
  }
  func.func @transform_5(%arg0: i32) -> (i32, i32) {
    %c0_i32 = arith.constant 0 : i32
    %c0_i32_0 = arith.constant 0 : i32
    %c0_i32_1 = arith.constant 0 : i32
    return %c0_i32, %c0_i32_0 : i32, i32
  }
  func.func @transform_6(%arg0: i32) -> (i32, i32) {
    %c0_i32 = arith.constant 0 : i32
    %c0_i32_0 = arith.constant 0 : i32
    %c0_i32_1 = arith.constant 0 : i32
    return %c0_i32, %c0_i32_0 : i32, i32
  }
  func.func @transform_7(%arg0: i32) -> (i32, i32) {
    %c0_i32 = arith.constant 0 : i32
    %c0_i32_0 = arith.constant 0 : i32
    %c0_i32_1 = arith.constant 0 : i32
    return %c0_i32, %c0_i32_0 : i32, i32
  }
  func.func @transform_8(%arg0: i32) -> (i32, i32) {
    %c0_i32 = arith.constant 0 : i32
    %c0_i32_0 = arith.constant 0 : i32
    %c0_i32_1 = arith.constant 0 : i32
    return %c0_i32, %c0_i32_0 : i32, i32
  }
  func.func @transform_9(%arg0: i32) -> (i32, i32) {
    %c0_i32 = arith.constant 0 : i32
    %c0_i32_0 = arith.constant 0 : i32
    %c0_i32_1 = arith.constant 0 : i32
    return %c0_i32, %c0_i32_0 : i32, i32
  }
  func.func @transform_10(%arg0: i32) -> (i32, i32) {
    %c0_i32 = arith.constant 0 : i32
    %c0_i32_0 = arith.constant 0 : i32
    %c0_i32_1 = arith.constant 0 : i32
    return %c0_i32, %c0_i32_0 : i32, i32
  }
  func.func @transform_11(%arg0: i32) -> (i32, i32) {
    %c0_i32 = arith.constant 0 : i32
    %c0_i32_0 = arith.constant 0 : i32
    %c0_i32_1 = arith.constant 0 : i32
    return %c0_i32, %c0_i32_0 : i32, i32
  }
  func.func @transform_12(%arg0: i32) -> (i32, i32) {
    %c0_i32 = arith.constant 0 : i32
    %c0_i32_0 = arith.constant 0 : i32
    %c0_i32_1 = arith.constant 0 : i32
    return %c0_i32, %c0_i32_0 : i32, i32
  }
  func.func @transform_13(%arg0: i32) -> (i32, i32) {
    %c0_i32 = arith.constant 0 : i32
    %c0_i32_0 = arith.constant 0 : i32
    %c0_i32_1 = arith.constant 0 : i32
    return %c0_i32, %c0_i32_0 : i32, i32
  }
  func.func @transform_14(%arg0: i32) -> (i32, i32) {
    %c0_i32 = arith.constant 0 : i32
    %c0_i32_0 = arith.constant 0 : i32
    %c0_i32_1 = arith.constant 0 : i32
    return %c0_i32, %c0_i32_0 : i32, i32
  }
  func.func @transform_15(%arg0: i32) -> (i32, i32) {
    %c0_i32 = arith.constant 0 : i32
    %c0_i32_0 = arith.constant 0 : i32
    %c0_i32_1 = arith.constant 0 : i32
    return %c0_i32, %c0_i32_0 : i32, i32
  }
  func.func @transform_16(%arg0: i32) -> (i32, i32) {
    %c0_i32 = arith.constant 0 : i32
    %c0_i32_0 = arith.constant 0 : i32
    %c0_i32_1 = arith.constant 0 : i32
    return %c0_i32, %c0_i32_0 : i32, i32
  }
  func.func @transform_17(%arg0: i32) -> (i32, i32) {
    %c0_i32 = arith.constant 0 : i32
    %c0_i32_0 = arith.constant 0 : i32
    %c0_i32_1 = arith.constant 0 : i32
    return %c0_i32, %c0_i32_0 : i32, i32
  }
  func.func @transform_18(%arg0: i32) -> (i32, i32) {
    %c0_i32 = arith.constant 0 : i32
    %c0_i32_0 = arith.constant 0 : i32
    %c0_i32_1 = arith.constant 0 : i32
    return %c0_i32, %c0_i32_0 : i32, i32
  }
  func.func @transform_19(%arg0: i32) -> (i32, i32) {
    %c0_i32 = arith.constant 0 : i32
    %c0_i32_0 = arith.constant 0 : i32
    %c0_i32_1 = arith.constant 0 : i32
    return %c0_i32, %c0_i32_0 : i32, i32
  }
  func.func @transform_20(%arg0: i32) -> (i32, i32) {
    %c0_i32 = arith.constant 0 : i32
    %c0_i32_0 = arith.constant 0 : i32
    %c0_i32_1 = arith.constant 0 : i32
    return %c0_i32, %c0_i32_0 : i32, i32
  }
  func.func @transform_21(%arg0: i32) -> (i32, i32) {
    %c0_i32 = arith.constant 0 : i32
    %c0_i32_0 = arith.constant 0 : i32
    %c0_i32_1 = arith.constant 0 : i32
    return %c0_i32, %c0_i32_0 : i32, i32
  }
  func.func @transform_22(%arg0: i32) -> (i32, i32) {
    %c0_i32 = arith.constant 0 : i32
    %c0_i32_0 = arith.constant 0 : i32
    %c0_i32_1 = arith.constant 0 : i32
    return %c0_i32, %c0_i32_0 : i32, i32
  }
  func.func @transform_23(%arg0: i32) -> (i32, i32) {
    %c0_i32 = arith.constant 0 : i32
    %c0_i32_0 = arith.constant 0 : i32
    %c0_i32_1 = arith.constant 0 : i32
    return %c0_i32, %c0_i32_0 : i32, i32
  }
  func.func @transform_24(%arg0: i32) -> (i32, i32) {
    %c0_i32 = arith.constant 0 : i32
    %c0_i32_0 = arith.constant 0 : i32
    return %arg0, %c0_i32 : i32, i32
  }
  func.func @transform_25(%arg0: i32) -> (i32, i32) {
    %c0_i32 = arith.constant 0 : i32
    %c0_i32_0 = arith.constant 0 : i32
    return %arg0, %c0_i32 : i32, i32
  }
  func.func @transform_26(%arg0: i32) -> (i32, i32) {
    %c0_i32 = arith.constant 0 : i32
    %c0_i32_0 = arith.constant 0 : i32
    return %arg0, %c0_i32 : i32, i32
  }
  func.func @transform_27(%arg0: i32) -> (i32, i32) {
    %c0_i32 = arith.constant 0 : i32
    %c0_i32_0 = arith.constant 0 : i32
    return %arg0, %c0_i32 : i32, i32
  }
  func.func @transform_28(%arg0: i32) -> (i32, i32) {
    %c0_i32 = arith.constant 0 : i32
    %c0_i32_0 = arith.constant 0 : i32
    return %arg0, %c0_i32 : i32, i32
  }
  func.func @transform_29(%arg0: i32) -> (i32, i32) {
    %c0_i32 = arith.constant 0 : i32
    %c0_i32_0 = arith.constant 0 : i32
    return %arg0, %c0_i32 : i32, i32
  }
  func.func @transform_30(%arg0: i32) -> (i32, i32) {
    %c0_i32 = arith.constant 0 : i32
    %c0_i32_0 = arith.constant 0 : i32
    return %arg0, %c0_i32 : i32, i32
  }
}

</mosaic_0001>

<bundles_post_ra>
// kernel: cvae_forward.1
= control target key start
LH: loop header
LB: loop body
LE: loop exit
PB: predicated region body
PF: predicated region fallthrough
CT: control target
= control target key end

     0   :  { %s3575_s6 = smov 1   ;;  %s3576_s10 = smov 2   ;;  %s4125_s0 = inlined_call_operand.smem [shape: u32[31], index: -1, kind: input, shape index: {}] }
   0x1   :  { %s3624_s5 = sld [smem:[%s4125_s0]]   ;;  %s3577_s14 = smov 3  }
   0x2   :  { %s3629_s9 = sld [smem:[%s4125_s0 + %s3575_s6]]   ;;  %s3578_s18 = smov 4  }
   0x3   :  { %s3634_s13 = sld [smem:[%s4125_s0 + %s3576_s10]]   ;;  %s3579_s22 = smov 5  }
   0x4   :  { %s3639_s17 = sld [smem:[%s4125_s0 + %s3577_s14]]   ;;  %s3580_s26 = smov 6  }
   0x5   :  { %s3644_s21 = sld [smem:[%s4125_s0 + %s3578_s18]]   ;;  %s3581_s30 = smov 7  }
   0x6   :  { %s3649_s25 = sld [smem:[%s4125_s0 + %s3579_s22]]   ;;  %s3582_s4 = smov 8  }
   0x7   :  { %s3654_s29 = sld [smem:[%s4125_s0 + %s3580_s26]]   ;;  %s3583_s10 = smov 9  }
   0x8   :  { %s3659_s3 = sld [smem:[%s4125_s0 + %s3581_s30]]   ;;  %s3584_s15 = smov 10  }
   0x9   :  { %4130 = sst [smem:[#allocation16_spill]] %s3634_s13  ;;  %s3585_s20 = smov 11  }
   0xa   :  { %4131 = sst [smem:[#allocation17_spill]] %s3639_s17  ;;  %s3586_s26 = smov 12  }
   0xb   :  { %4132 = sst [smem:[#allocation18_spill]] %s3644_s21  ;;  %s3587_s1 = smov 13  }
   0xc   :  { %s3664_s8 = sld [smem:[%s4125_s0 + %s3582_s4]]   ;;  %s3588_s7 = smov 14  }
   0xd   :  { %s3669_s14 = sld [smem:[%s4125_s0 + %s3583_s10]]   ;;  %s3590_s22 = smov 16  }
   0xe   :  { %s3674_s19 = sld [smem:[%s4125_s0 + %s3584_s15]]   ;;  %s3589_s15 = smov 15  }
   0xf   :  { %s3679_s24 = sld [smem:[%s4125_s0 + %s3585_s20]]   ;;  %s3591_s28 = smov 17  }
  0x10   :  { %s3684_s30 = sld [smem:[%s4125_s0 + %s3586_s26]]  }
  0x11   :  { %s3689_s6 = sld [smem:[%s4125_s0 + %s3587_s1]]  }
  0x12   :  { %4133 = sst [smem:[#allocation19_spill]] %s3664_s8 }
  0x13   :  { %s3694_s12 = sld [smem:[%s4125_s0 + %s3588_s7]]   ;;  %s3592_s7 = smov 18  }
  0x14   :  { %s3699_s20 = sld [smem:[%s4125_s0 + %s3589_s15]]   ;;  %s3593_s15 = smov 19  }
  0x15   :  { %s3704_s27 = sld [smem:[%s4125_s0 + %s3590_s22]]   ;;  %s3594_s22 = smov 20  }
  0x16   :  { %4134 = sst [smem:[#allocation20_spill]] %s3684_s30 }
  0x17   :  { %s3709_s4 = sld [smem:[%s4125_s0 + %s3591_s28]]   ;;  %s3595_s28 = smov 21  }
  0x18   :  { %s3714_s21 = sld [smem:[%s4125_s0 + %s3592_s7]]   ;;  %s3596_s7 = smov 22  }
  0x19   :  { %4135 = sst [smem:[#allocation21_spill]] %s3694_s12 }
  0x1a   :  { %4136 = sst [smem:[#allocation22_spill]] %s3699_s20 }
  0x1b   :  { %4137 = sst [smem:[#allocation23_spill]] %s3704_s27 }
  0x1c   :  { %s3719_s17 = sld [smem:[%s4125_s0 + %s3593_s15]]   ;;  %s3597_s15 = smov 23  }
  0x1d   :  { %s3724_s27 = sld [smem:[%s4125_s0 + %s3594_s22]]   ;;  %s3598_s22 = smov 24  }
  0x1e   :  { %s3729_s12 = sld [smem:[%s4125_s0 + %s3595_s28]]   ;;  %s3599_s28 = smov 25  }
  0x1f   :  { %s3734_s13 = sld [smem:[%s4125_s0 + %s3596_s7]]   ;;  %s3600_s7 = smov 26  }
  0x20   :  { %s3744_s20 = sld [smem:[%s4125_s0 + %s3598_s22]]   ;;  %s3602_s22 = smov 28  }
  0x21   :  { %s3754_s30 = sld [smem:[%s4125_s0 + %s3600_s7]]   ;;  %s3604_s7 = smov 30  }
  0x22   :  { %4138 = sst [smem:[#allocation24_spill]] %s3719_s17 }
  0x23   :  { %s3739_s17 = sld [smem:[%s4125_s0 + %s3597_s15]]   ;;  %s3601_s15 = smov 27  }
  0x24   :  { %4139 = sst [smem:[#allocation25_spill]] %s3729_s12 }
  0x25   :  { %s3749_s12 = sld [smem:[%s4125_s0 + %s3599_s28]]   ;;  %s3603_s28 = smov 29  }
  0x26   :  { %4141 = sst [smem:[#allocation27_spill]] %s3744_s20 }
  0x27   :  { %4143 = sst [smem:[#allocation29_spill]] %s3754_s30 }
  0x28   :  { %s3764_s20 = sld [smem:[%s4125_s0 + %s3602_s22]]  }
  0x29   :  { %4140 = sst [smem:[#allocation26_spill]] %s3739_s17 }
  0x2a   :  { %s3759_s17 = sld [smem:[%s4125_s0 + %s3601_s15]]  }
  0x2b   :  { %4142 = sst [smem:[#allocation28_spill]] %s3749_s12 }
  0x2c   :  { %s3769_s12 = sld [smem:[%s4125_s0 + %s3603_s28]]  }
  0x2d   :  { %s3774_s30 = sld [smem:[%s4125_s0 + %s3604_s7]]  }
  0x2e   :  { %67 = vsyncpa [#allocation3], 0 }
  0x2f   :  { %68 = vsyncpa [#allocation5], 0 }
  0x30   :  { %69 = vsyncpa [#allocation8], 0 }
  0x31   :  { %70 = vsyncpa [#allocation11], 0  ;;  %s3776_s15 = smov 0  }
  0x32 LB: > { %s4144_s8 = sld [smem:[#allocation19_spill]]  ;;  %s3605_s16 = smov [#allocation4]   ;;  %s3573_s15 = sphi %s3776_s15, %s76_s15  }
  0x33   : > { %s828_s18 = sshll.u32 %s3605_s16, 4  ;;  %s3782_s22 = sadd.s32 4294967295, %s3573_s15   ;;  %s3787_s18 = int_to_ptr.vmem [resolvable:$true] %s828_s18 }
  0x34   : > { %p2781_p0 = scmp.ge.s32.totalorder %s3573_s15, 1  ;;  %p792_p1 = scmp.lt.s32.totalorder %s3573_s15, 3 }
  0x35   : > { %p4127_p2 = scmp.eq.s32.totalorder %s3782_s22, 0  ;;  %s3606_s23 = smov [#allocation7]  }
  0x36   : > { %p3789_p3 = pnand %p2781_p0, %p792_p1  ;;  %s869_s26 = sshll.u32 %s3606_s23, 4  ;;  %s3795_s26 = int_to_ptr.vmem [resolvable:$true] %s869_s26 }
  0x37   : > { %s3607_s1 = smov [#allocation2]   ;;  %s3608_s7 = smov [#allocation6]  }
  0x38   : > { %s4145_s0 = scalar_select %p3789_p3, 1, 0 }
  0x39   : > { %p3177_p4 = pneg %p3789_p3  ;;  %s814_s2 = sshll.u32 %s3607_s1, 4  ;;  %s3803_s2 = int_to_ptr.vmem [resolvable:$true] %s814_s2 }
  0x3a   : > { %s3805_s10 = sshll.u32 %s3608_s7, 4  ;;  %s3383_s11 = scalar_lea.hbm %s3674_s19, 32  ;;  %s857_s10 = int_to_ptr.vmem [resolvable:$true] %s3805_s10 }
  0x3b   : > { %p3799_p5 = pnand %p4127_p2, %p3177_p4  ;;  %p3384_p6 = scmp.ne.s32.totalorder %s3674_s19, %s3383_s11 }
  0x3c   : > { %p3390_p10 = scmp.lt.u32.totalorder %s3383_s11, %s3674_s19 }
  0x3d   : > { %p3811_p7 = pneg %p3799_p5 }
  0x3f   : > { %p3386_p8 = pnand %p3811_p7, %p3384_p6 }
  0x41   : > { %p3387_p9 = pneg %p3386_p8 }
  0x43   : > { %p3392_p11 = pnand %p3390_p10, %p3387_p9 }
  0x45   : > { %3395 = shalt.err (!%p3392_p11)
}
  0x46   : > { %s3396_s23 = scalar_lea.vmem %s3787_s18, 32  ;;  %p3404_p1 = scmp.lt.s32.totalorder %s3787_s18, %s3787_s18 }
  0x47   : > { %p3397_p12 = scmp.ne.s32.totalorder %s3787_s18, %s3396_s23  ;;  %p3405_p4 = scmp.lt.s32.totalorder %s3396_s23, %s3396_s23 }
  0x49   : > { %p3399_p13 = pnand %p3397_p12, %p3811_p7  ;;  %p3406_p2 = por %p3405_p4, %p3404_p1 }
  0x4b   : > { %p3400_p0 = pneg %p3399_p13 }
  0x4d   : > { %p3407_p3 = pnand %p3406_p2, %p3400_p0 }
  0x4f   : > { %3410 = shalt.err (!%p3407_p3)
}
  0x50   : > { %3183 = dma.hbm_to_vmem [thread:$0]  (!%p3799_p5), %s3674_s19, 32, %s3787_s18, [#allocation5]  }
  0x51   : > { %s3411_s1 = scalar_lea.hbm %s3714_s21, 1024 }
  0x52   : > { %p3412_p6 = scmp.ne.s32.totalorder %s3714_s21, %s3411_s1  ;;  %p3418_p10 = scmp.lt.u32.totalorder %s3411_s1, %s3714_s21 }
  0x54   : > { %p3414_p8 = pnand %p3412_p6, %p3811_p7 }
  0x56   : > { %p3415_p9 = pneg %p3414_p8 }
  0x58   : > { %p3420_p11 = pnand %p3418_p10, %p3415_p9 }
  0x5a   : > { %3423 = shalt.err (!%p3420_p11)
}
  0x5b   : > { %s3424_s7 = scalar_lea.vmem %s3795_s26, 1024  ;;  %p3432_p13 = scmp.lt.s32.totalorder %s3795_s26, %s3795_s26 }
  0x5c   : > { %p3425_p2 = scmp.ne.s32.totalorder %s3795_s26, %s3424_s7  ;;  %p3433_p0 = scmp.lt.s32.totalorder %s3424_s7, %s3424_s7 }
  0x5e   : > { %p3427_p3 = pnand %p3425_p2, %p3811_p7  ;;  %p3434_p1 = por %p3433_p0, %p3432_p13 }
  0x60   : > { %p3428_p12 = pneg %p3427_p3 }
  0x62   : > { %p3435_p4 = pnand %p3434_p1, %p3428_p12 }
  0x64   : > { %3438 = shalt.err (!%p3435_p4)
}
  0x65   : > { %s3609_s18 = smov 64   ;;  %s3610_s11 = smov 4  }
  0x66   : > { %3189 = dma.hbm_to_vmem [thread:$0]  (!%p3799_p5), %s3714_s21, 1024, %s3795_s26, [#allocation8], %s3609_s18, %s3609_s18, %s3610_s11  }
  0x67   : > { %s3439_s23 = scalar_lea.hbm %s4144_s8, 16 }
  0x68   : > { %p3440_p6 = scmp.ne.s32.totalorder %s4144_s8, %s3439_s23  ;;  %p3446_p10 = scmp.lt.u32.totalorder %s3439_s23, %s4144_s8 }
  0x6a   : > { %p3442_p8 = pnand %p3440_p6, %p3811_p7 }
  0x6c   : > { %p3443_p9 = pneg %p3442_p8 }
  0x6e   : > { %p3448_p11 = pnand %p3446_p10, %p3443_p9 }
  0x70   : > { %3451 = shalt.err (!%p3448_p11)
}
  0x71   : > { %s3452_s1 = scalar_lea.vmem %s3803_s2, 16  ;;  %s3459_s7 = scalar_lea.vmem %s3803_s2, 32 }
  0x72   : > { %p3453_p2 = scmp.ne.s32.totalorder %s3803_s2, %s3452_s1  ;;  %p3460_p13 = scmp.lt.s32.totalorder %s3803_s2, %s3803_s2 }
  0x73   : > { %p3461_p0 = scmp.lt.s32.totalorder %s3459_s7, %s3452_s1 }
  0x74   : > { %p3455_p3 = pnand %p3453_p2, %p3811_p7 }
  0x75   : > { %p3462_p1 = por %p3461_p0, %p3460_p13 }
  0x76   : > { %p3456_p12 = pneg %p3455_p3 }
  0x78   : > { %p3463_p4 = pnand %p3462_p1, %p3456_p12 }
  0x7a   : > { %3466 = shalt.err (!%p3463_p4)
}
  0x7b   : > { %3180 = dma.hbm_to_vmem [thread:$0]  (!%p3799_p5), %s4144_s8, 16, %s3803_s2, [#allocation3]  }
  0x7c   : > { %s3467_s26 = scalar_lea.hbm %s3709_s4, 1024 }
  0x7d   : > { %p3468_p6 = scmp.ne.s32.totalorder %s3709_s4, %s3467_s26  ;;  %p3474_p10 = scmp.lt.u32.totalorder %s3467_s26, %s3709_s4 }
  0x7f   : > { %p3470_p8 = pnand %p3468_p6, %p3811_p7 }
  0x81   : > { %p3471_p9 = pneg %p3470_p8 }
  0x83   : > { %p3476_p11 = pnand %p3474_p10, %p3471_p9 }
  0x85   : > { %3479 = shalt.err (!%p3476_p11)
}
  0x86   : > { %s3480_s23 = scalar_lea.vmem %s857_s10, 1024  ;;  %p3488_p13 = scmp.lt.s32.totalorder %s857_s10, %s857_s10 }
  0x87   : > { %p3481_p2 = scmp.ne.s32.totalorder %s857_s10, %s3480_s23  ;;  %p3489_p0 = scmp.lt.s32.totalorder %s3480_s23, %s3480_s23 }
  0x89   : > { %p3483_p3 = pnand %p3481_p2, %p3811_p7  ;;  %p3490_p1 = por %p3489_p0, %p3488_p13 }
  0x8b   : > { %p3484_p12 = pneg %p3483_p3 }
  0x8d   : > { %p3491_p4 = pnand %p3490_p1, %p3484_p12 }
  0x8f   : > { %3494 = shalt.err (!%p3491_p4)
}
  0x90   : > { %3186 = dma.hbm_to_vmem [thread:$0]  (!%p3799_p5), %s3709_s4, 1024, %s857_s10, [#allocation5], %s3609_s18, %s3609_s18, %s3610_s11  }
  0x91   : > { %s3611_s2 = smov [#allocation9]   ;;  %s3612_s7 = smov [#allocation10]  }
  0x92   : > { %s885_s1 = sshll.u32 %s3611_s2, 4  ;;  %s901_s26 = sshll.u32 %s3612_s7, 4  ;;  %s886_s1 = int_to_ptr.vmem [resolvable:$true] %s885_s1  ;;  %s902_s26 = int_to_ptr.vmem [resolvable:$true] %s901_s26 }
  0x93   : > { %s3495_s23 = scalar_lea.hbm %s3724_s27, 1024 }
  0x94   : > { %p3496_p6 = scmp.ne.s32.totalorder %s3724_s27, %s3495_s23  ;;  %p3502_p10 = scmp.lt.u32.totalorder %s3495_s23, %s3724_s27 }
  0x96   : > { %p3498_p8 = pnand %p3496_p6, %p3811_p7 }
  0x98   : > { %p3499_p9 = pneg %p3498_p8 }
  0x9a   : > { %p3504_p11 = pnand %p3502_p10, %p3499_p9 }
  0x9c   : > { %3507 = shalt.err (!%p3504_p11)
}
  0x9d   : > { %s3508_s8 = scalar_lea.vmem %s886_s1, 1024  ;;  %p3516_p13 = scmp.lt.s32.totalorder %s886_s1, %s886_s1 }
  0x9e   : > { %p3509_p2 = scmp.ne.s32.totalorder %s886_s1, %s3508_s8  ;;  %p3517_p0 = scmp.lt.s32.totalorder %s3508_s8, %s3508_s8 }
  0xa0   : > { %p3511_p3 = pnand %p3509_p2, %p3811_p7  ;;  %p3518_p1 = por %p3517_p0, %p3516_p13 }
  0xa2   : > { %p3512_p12 = pneg %p3511_p3 }
  0xa4   : > { %p3519_p4 = pnand %p3518_p1, %p3512_p12 }
  0xa6   : > { %3522 = shalt.err (!%p3519_p4)
}
  0xa7   : > { %3192 = dma.hbm_to_vmem [thread:$0]  (!%p3799_p5), %s3724_s27, 1024, %s886_s1, [#allocation8], %s3609_s18, %s3609_s18, %s3610_s11  }
  0xa8   : > { %s3523_s10 = scalar_lea.hbm %s3734_s13, 1024 }
  0xa9   : > { %p3524_p6 = scmp.ne.s32.totalorder %s3734_s13, %s3523_s10  ;;  %p3530_p10 = scmp.lt.u32.totalorder %s3523_s10, %s3734_s13 }
  0xab   : > { %p3526_p8 = pnand %p3524_p6, %p3811_p7 }
  0xad   : > { %p3527_p9 = pneg %p3526_p8 }
  0xaf   : > { %p3532_p11 = pnand %p3530_p10, %p3527_p9 }
  0xb1   : > { %3535 = shalt.err (!%p3532_p11)
}
  0xb2   : > { %s3536_s8 = scalar_lea.vmem %s902_s26, 1024  ;;  %p3544_p13 = scmp.lt.s32.totalorder %s902_s26, %s902_s26 }
  0xb3   : > { %p3537_p2 = scmp.ne.s32.totalorder %s902_s26, %s3536_s8  ;;  %p3545_p0 = scmp.lt.s32.totalorder %s3536_s8, %s3536_s8 }
  0xb5   : > { %p3539_p3 = pnand %p3537_p2, %p3811_p7  ;;  %p3546_p1 = por %p3545_p0, %p3544_p13 }
  0xb7   : > { %p3540_p12 = pneg %p3539_p3 }
  0xb9   : > { %p3547_p4 = pnand %p3546_p1, %p3540_p12 }
  0xbb   : > { %3550 = shalt.err (!%p3547_p4)
}
  0xbc   : > { %3195 = dma.hbm_to_vmem [thread:$0]  (!%p3799_p5), %s3734_s13, 1024, %s902_s26, [#allocation11], %s3609_s18, %s3609_s18, %s3610_s11  }
  0xbd   : > { %p4148_p6 = scmp.ne.s32.totalorder %s4145_s0, 0 }
  0xbe   : > { %p4149_p8 = scmp.eq.s32.totalorder (!%p4148_p6), %s3782_s22, 0 }
  0xbf   : > { %955 = sbr.rel (%p4148_p6) target bundleno = 1854 (0x73e), region = 116 }
  0xc6   : > { %3556 = dma.done.wait (%p4149_p8), [#allocation3], 16   ;;  %p4150_p7 = pmov %p4149_p8 }
  0xc8   : > { %3558 = vsyncadd (%p4150_p7), [#allocation3], 4294967280  ;;  %p4151_p9 = pmov %p4150_p7 }
  0xc9   : > { %p4152_p10 = pmov %p4150_p7 }
  0xca   : > { %3560 = dma.done.wait (%p4151_p9), [#allocation5], 1056  }
  0xcb   : > { %3562 = vsyncadd (%p4152_p10), [#allocation5], 4294966240  ;;  %p4153_p11 = pmov %p4150_p7 }
  0xcc   : > { %p4154_p5 = pmov %p4150_p7 }
  0xcd   : > { %3564 = dma.done.wait (%p4153_p11), [#allocation8], 2048  }
  0xce   : > { %3566 = vsyncadd (%p4154_p5), [#allocation8], 4294965248  ;;  %p4155_p2 = pmov %p4154_p5 }
  0xd0   : > { %3568 = dma.done.wait (%p4155_p2), [#allocation11], 1024   ;;  %p4156_p3 = pmov %p4155_p2 }
  0xd1   : > { %v3613_v0 = vmov 0.0   ;;  %vm3614_vm0 = vmmov 0   ;;  %v3257_v1 = vld [vmem:[%s3649_s25] sm:$0xff]   ;;  %v3258_v2 = vld [vmem:[%s3649_s25 + $0x8] sm:$0xff]   ;;  %v3259_v3 = vld [vmem:[%s3649_s25 + $0x10] sm:$0xff]   ;;  %p1094_p12 = scmp.lt.s32.totalorder %s3782_s22, 1 }
  0xd2   : > { %3570 = vsyncadd (%p4156_p3), [#allocation11], 4294966272  ;;  %2993 = vmatprep.subr.bf16.mxu0 %v3613_v0  ;;  %3009 = vmatprep.mubr.msk.bf16.mxu0 %vm3614_vm0, %v3613_v0  ;;  %v3265_v4 = vld [vmem:[%s3659_s3] sm:$0xff]   ;;  %v3260_v5 = vld [vmem:[%s3649_s25 + $0x18] sm:$0xff]   ;;  %v3615_v53 = vmov 0   ;;  %s4157_s18 = sld [smem:[#allocation20_spill]] }
  0xd3   : > { %3013 = vmatprep.subr.bf16.mxu1 %v3613_v0  ;;  %3029 = vmatprep.mubr.msk.bf16.mxu1 %vm3614_vm0, %v3613_v0  ;;  %s4171_s22 = smov (!%p1094_p12, %s3782_s22), 1  ;;  %v3266_v6 = vld [vmem:[%s3659_s3 + $0x8] sm:$0xff]   ;;  %v3261_v7 = vld [vmem:[%s3649_s25 + $0x20] sm:$0xff]   ;;  %v3267_v8 = vld [vmem:[%s3659_s3 + $0x10] sm:$0xff]   ;;  %s4158_s11 = sld [smem:[#allocation22_spill]] }
  0xd4   : > { %2994 = vmatpush3.bf16.msra.mxu0 %v3257_v1  ;;  %3014 = vmatpush3.bf16.msra.mxu1 %v3265_v4  ;;  %s3943_s0 = sshll.u32 %s4171_s22, 3  ;;  %v3262_v9 = vld [vmem:[%s3649_s25 + $0x28] sm:$0xff]   ;;  %v3268_v10 = vld [vmem:[%s3659_s3 + $0x18] sm:$0xff]   ;;  %v3263_v11 = vld [vmem:[%s3649_s25 + $0x30] sm:$0xff]   ;;  %s4159_s2 = sld [smem:[#allocation27_spill]] }
  0xd5   : > { %2995 = vmatprep.subr.bf16.mxu0 %v3613_v0  ;;  %3015 = vmatprep.subr.bf16.mxu1 %v3613_v0  ;;  %s1097_s28 = scalar_lea.vmem %s3624_s5, %s3943_s0  ;;  %v3269_v12 = vld [vmem:[%s3659_s3 + $0x20] sm:$0xff]   ;;  %v3264_v13 = vld [vmem:[%s3649_s25 + $0x38] sm:$0xff]   ;;  %v3270_v15 = vld [vmem:[%s3659_s3 + $0x28] sm:$0xff]   ;;  %s1101_s16 = scalar_lea.vmem %s3629_s9, %s3943_s0 }
  0xd6   : > { %v3957_v14 = vld [vmem:[%s1097_s28] sm:$0xff]  ;;  %v3271_v17 = vld [vmem:[%s3659_s3 + $0x30] sm:$0xff]   ;;  %v3272_v18 = vld [vmem:[%s3659_s3 + $0x38] sm:$0xff]   ;;  %s4160_s1 = sld [smem:[#allocation16_spill]]  ;;  %s4052_s7 = sshll.u32 %s4171_s22, 4 }
  0xd7   : > { %v1164_v16 = vpack.c.bf16 %v3957_v14, %v3957_v14  ;;  %v3281_v19 = vld [vmem:[%s3669_s14] ss:$8 sps:$4 sm:$0xff]   ;;  %v3283_v20 = vld [vmem:[%s3669_s14 + $0x4] ss:$8 sps:$4 sm:$0xff]   ;;  %v3286_v21 = vld [vmem:[%s3669_s14 + $0x14] ss:$8 sps:$4 sm:$0xff]  }
  0xd8   : > { %2996 = vmatpush3.bf16.msra.mxu0 %v3258_v2  ;;  %3016 = vmatpush3.bf16.msra.mxu1 %v3266_v6  ;;  %v3284_v22 = vld [vmem:[%s3669_s14 + $0x10] ss:$8 sps:$4 sm:$0xff]   ;;  %v3289_v23 = vld [vmem:[%s3669_s14 + $0x24] ss:$8 sps:$4 sm:$0xff]   ;;  %v3287_v24 = vld [vmem:[%s3669_s14 + $0x20] ss:$8 sps:$4 sm:$0xff]  }
  0xd9   : > { %2997 = vmatprep.subr.bf16.mxu0 %v3613_v0  ;;  %3017 = vmatprep.subr.bf16.mxu1 %v3613_v0  ;;  %v3292_v25 = vld [vmem:[%s3669_s14 + $0x34] ss:$8 sps:$4 sm:$0xff]   ;;  %v3290_v26 = vld [vmem:[%s3669_s14 + $0x30] ss:$8 sps:$4 sm:$0xff]   ;;  %v3295_v27 = vld [vmem:[%s3669_s14 + $0x44] ss:$8 sps:$4 sm:$0xff]  }
  0xda   : > { %v3293_v28 = vld [vmem:[%s3669_s14 + $0x40] ss:$8 sps:$4 sm:$0xff]   ;;  %v3298_v29 = vld [vmem:[%s3669_s14 + $0x54] ss:$8 sps:$4 sm:$0xff]   ;;  %v3296_v30 = vld [vmem:[%s3669_s14 + $0x50] ss:$8 sps:$4 sm:$0xff]   ;;  %s1118_s26 = scalar_lea.vmem %s4159_s2, %s4052_s7 }
  0xdb   : > { %v3301_v31 = vld [vmem:[%s3669_s14 + $0x64] ss:$8 sps:$4 sm:$0xff]   ;;  %v3299_v32 = vld [vmem:[%s3669_s14 + $0x60] ss:$8 sps:$4 sm:$0xff]   ;;  %v3275_v43 = vld [vmem:[%s3679_s24 + $0x10] sm:$0xff]   ;;  %s4161_s23 = sld [smem:[#allocation28_spill]] }
  0xdc   : > { %2998 = vmatpush3.bf16.msra.mxu0 %v3259_v3  ;;  %3018 = vmatpush3.bf16.msra.mxu1 %v3267_v8  ;;  %v2811_v33 = vld [vmem:[%s3654_s29] ss:$0 sm:$0xff]  ;;  %v3274_v42 = vld [vmem:[%s3679_s24 + $0x8] sm:$0xff]   ;;  %v3276_v44 = vld [vmem:[%s3679_s24 + $0x18] sm:$0xff]   ;;  %s4162_s10 = sld [smem:[#allocation21_spill]]  ;;  %s1105_s22 = scalar_lea.vmem %s4160_s1, %s3943_s0 }
  0xdd   : > { %2999 = vmatprep.subr.bf16.mxu0 %v3613_v0  ;;  %3019 = vmatprep.subr.bf16.mxu1 %v3613_v0  ;;  %v3273_v40 = vld [vmem:[%s3679_s24] sm:$0xff]   ;;  %v3278_v46 = vld [vmem:[%s3679_s24 + $0x28] sm:$0xff]   ;;  %v3279_v47 = vld [vmem:[%s3679_s24 + $0x30] sm:$0xff]   ;;  %s4163_s28 = sld [smem:[#allocation23_spill]]  ;;  %s4165_s2 = sld [smem:[#allocation17_spill]] }
  0xde   : > { %v3277_v45 = vld [vmem:[%s3679_s24 + $0x20] sm:$0xff]   ;;  %v3280_v49 = vld [vmem:[%s3679_s24 + $0x38] sm:$0xff]   ;;  %v3306_v63 = vld [vmem:[%s3689_s6 + $0x8] sm:$0xff]   ;;  %s1132_s1 = scalar_lea.vmem %s3759_s17, %s4052_s7 }
  0xdf   : > { %v1533_v48 = vld [vmem:[%s1101_s16] sm:$0xff]  ;;  %v3304_v51 = vld [vmem:[%s3669_s14 + $0x74] ss:$8 sps:$4 sm:$0xff]   ;;  %v3302_v52 = vld [vmem:[%s3669_s14 + $0x70] ss:$8 sps:$4 sm:$0xff]   ;;  %s4164_s16 = sld [smem:[#allocation29_spill]] }
  0xe0   : > { %3000 = vmatpush3.bf16.msra.mxu0 %v3260_v5  ;;  %3020 = vmatpush3.bf16.msra.mxu1 %v3268_v10  ;;  %v1551_v50 = vpack.c.bf16 %v1533_v48, %v3957_v14  ;;  %v2820_v54 = vld [vmem:[#allocation2] ss:$0 sm:$0xff]  ;;  %v3307_v1 = vld [vmem:[%s3689_s6 + $0x10] sm:$0xff]   ;;  %v3308_v2 = vld [vmem:[%s3689_s6 + $0x18] sm:$0xff]  }
  0xe1   : > { %3001 = vmatprep.subr.bf16.mxu0 %v3613_v0  ;;  %3021 = vmatprep.subr.bf16.mxu1 %v3613_v0  ;;  %v3305_v61 = vld [vmem:[%s3689_s6] sm:$0xff]   ;;  %v3310_v4 = vld [vmem:[%s3689_s6 + $0x28] sm:$0xff]   ;;  %v3311_v5 = vld [vmem:[%s3689_s6 + $0x30] sm:$0xff]   ;;  %s1122_s8 = scalar_lea.vmem %s4161_s23, %s3943_s0 }
  0xe2   : > { %v3309_v3 = vld [vmem:[%s3689_s6 + $0x20] sm:$0xff]   ;;  %v3312_v8 = vld [vmem:[%s3689_s6 + $0x38] sm:$0xff]  }
  0xe3   : > { %v2845_v6 = vld [vmem:[%s4157_s18] ss:$0 sm:$0xff]  ;;  %s1109_s23 = scalar_lea.vmem %s4165_s2, %s3943_s0 }
  0xe4   : > { %3002 = vmatpush3.bf16.msra.mxu0 %v3261_v7  ;;  %3022 = vmatpush3.bf16.msra.mxu1 %v3269_v12 }
  0xe5   : > { %3003 = vmatprep.subr.bf16.mxu0 %v3613_v0  ;;  %3023 = vmatprep.subr.bf16.mxu1 %v3613_v0  ;;  %s1127_s18 = scalar_lea.vmem %s4164_s16, %s4052_s7  ;;  %s1140_s16 = scalar_lea.vmem %s3769_s12, %s3943_s0 }
  0xe8   : > { %3004 = vmatpush3.bf16.msra.mxu0 %v3262_v9  ;;  %3024 = vmatpush3.bf16.msra.mxu1 %v3270_v15 }
  0xe9   : > { %3005 = vmatprep.subr.bf16.mxu0 %v3613_v0  ;;  %3025 = vmatprep.subr.bf16.mxu1 %v3613_v0 }
  0xec   : > { %3006 = vmatpush3.bf16.msra.mxu0 %v3263_v11  ;;  %3026 = vmatpush3.bf16.msra.mxu1 %v3271_v17  ;;  %v3313_v17 = vld [vmem:[%s4158_s11] ss:$8 sps:$4 sm:$0xff]  }
  0xed   : > { %3007 = vmatprep.subr.bf16.mxu0 %v3613_v0  ;;  %3027 = vmatprep.subr.bf16.mxu1 %v3613_v0 }
  0xf0   : > { %3008 = vmatpush3.bf16.msra.mxu0 %v3264_v13  ;;  %3028 = vmatpush3.bf16.msra.mxu1 %v3272_v18  ;;  %v3315_v18 = vld [vmem:[%s4158_s11 + $0x4] ss:$8 sps:$4 sm:$0xff]  }
  0xf1   : > { %3033 = vmatprep.subr.bf16.mxu1 %v3613_v0  ;;  %1482 = vmatprep.subr.bf16.mxu0 %v3283_v20  ;;  %v3316_v20 = vld [vmem:[%s4158_s11 + $0x10] ss:$8 sps:$4 sm:$0xff]  }
  0xf3   : > { %3010 = vmatmul.mubr.bf16.vlgmr.msra.gmra.mrb[0].mxu0 %v1164_v16 }
  0xf4   : > { %1483 = vmatpush1.bf16.msra.mxu0 %v3281_v19  ;;  %1514 = vmatprep.mubr.bf16.mxu0 %v3615_v53  ;;  %v3318_v19 = vld [vmem:[%s4158_s11 + $0x14] ss:$8 sps:$4 sm:$0xff]  }
  0xf5   : > { %1484 = vmatprep.subr.bf16.mxu0 %v3286_v21  ;;  %v3321_v21 = vld [vmem:[%s4158_s11 + $0x24] ss:$8 sps:$4 sm:$0xff]  }
  0xf8   : > { %1485 = vmatpush1.bf16.msra.mxu0 %v3284_v22  ;;  %v3319_v22 = vld [vmem:[%s4158_s11 + $0x20] ss:$8 sps:$4 sm:$0xff]  }
  0xf9   : > { %1486 = vmatprep.subr.bf16.mxu0 %v3289_v23  ;;  %v3324_v23 = vld [vmem:[%s4158_s11 + $0x34] ss:$8 sps:$4 sm:$0xff]  }
  0xfc   : > { %1487 = vmatpush1.bf16.msra.mxu0 %v3287_v24  ;;  %v3322_v24 = vld [vmem:[%s4158_s11 + $0x30] ss:$8 sps:$4 sm:$0xff]  }
  0xfd   : > { %1488 = vmatprep.subr.bf16.mxu0 %v3292_v25  ;;  %v3327_v25 = vld [vmem:[%s4158_s11 + $0x44] ss:$8 sps:$4 sm:$0xff]  }
 0x100   : > { %1489 = vmatpush1.bf16.msra.mxu0 %v3290_v26  ;;  %v3325_v26 = vld [vmem:[%s4158_s11 + $0x40] ss:$8 sps:$4 sm:$0xff]  }
 0x101   : > { %1490 = vmatprep.subr.bf16.mxu0 %v3295_v27  ;;  %v3330_v27 = vld [vmem:[%s4158_s11 + $0x54] ss:$8 sps:$4 sm:$0xff]  }
 0x104   : > { %1491 = vmatpush1.bf16.msra.mxu0 %v3293_v28  ;;  %v3328_v28 = vld [vmem:[%s4158_s11 + $0x50] ss:$8 sps:$4 sm:$0xff]  }
 0x105   : > { %1492 = vmatprep.subr.bf16.mxu0 %v3298_v29  ;;  %v3333_v29 = vld [vmem:[%s4158_s11 + $0x64] ss:$8 sps:$4 sm:$0xff]  }
 0x108   : > { %1493 = vmatpush1.bf16.msra.mxu0 %v3296_v30  ;;  %v3331_v30 = vld [vmem:[%s4158_s11 + $0x60] ss:$8 sps:$4 sm:$0xff]  }
 0x109   : > { %1494 = vmatprep.subr.bf16.mxu0 %v3301_v31  ;;  %v3336_v31 = vld [vmem:[%s4158_s11 + $0x74] ss:$8 sps:$4 sm:$0xff]  }
 0x10c   : > { %1495 = vmatpush1.bf16.msra.mxu0 %v3299_v32  ;;  %v3334_v32 = vld [vmem:[%s4158_s11 + $0x70] ss:$8 sps:$4 sm:$0xff]  }
 0x10d   : > { %1496 = vmatprep.subr.bf16.mxu0 %v3304_v51 }
 0x110   : > { %1497 = vmatpush1.bf16.msra.mxu0 %v3302_v52 }
 0x111   : > { %3053 = vmatprep.subr.bf16.mxu0 %v3613_v0 }
 0x1c6   : > { %v1253_v34 = vpop.f32.mrb[0].mxu0 }
 0x1c7   : > { %v1254_v35 = vadd.f32 %v2811_v33, %v1253_v34  ;;  %v3011_v36 = vpop.f32.mrb[1].mxu0  ;;  %v3345_v33 = vld [vmem:[#allocation6] sm:$0xff]   ;;  %v1392_v34 = vlaneseq }
 0x1c8   : > { %v1256_v37 = vpop.f32.mrb[2].mxu0 }
 0x1c9   : > { %v1259_v38 = vmax.f32 %v1254_v35, 0.0  ;;  %v3012_v39 = vpop.f32.mrb[3].mxu0  ;;  %v4047_v35 = vshrl.u32 %v1392_v34, 7  ;;  %v1389_v37 = vld [vmem:[#allocation4] sm:$0x3] }
 0x1cb   : > { %v1277_v41 = vpack.c.bf16 %v1259_v38, %v1259_v38  ;;  %v1394_v36 = vsub.s32 0, %v4047_v35  ;;  %v1398_v38 = vsub.s32 1, %v4047_v35 }
 0x1cd   : > { %3030 = vmatmul.mubr.bf16.vlgmr.msra.gmra.mrb[0].mxu1 %v1277_v41  ;;  %v1395_v39 = vrot.slane %v1389_v37, %v1394_v36 }
 0x1ce   : > { %3034 = vmatpush3.bf16.msra.mxu1 %v3273_v40  ;;  %3049 = vmatprep.mubr.msk.bf16.mxu1 %vm3614_vm0, %v3613_v0  ;;  %v1399_v40 = vrot.slane %v1389_v37, %v1398_v38 }
 0x1cf   : > { %3035 = vmatprep.subr.bf16.mxu1 %v3613_v0 }
 0x1d2   : > { %3036 = vmatpush3.bf16.msra.mxu1 %v3274_v42 }
 0x1d3   : > { %3037 = vmatprep.subr.bf16.mxu1 %v3613_v0 }
 0x1d6   : > { %3038 = vmatpush3.bf16.msra.mxu1 %v3275_v43 }
 0x1d7   : > { %3039 = vmatprep.subr.bf16.mxu1 %v3613_v0 }
 0x1da   : > { %3040 = vmatpush3.bf16.msra.mxu1 %v3276_v44 }
 0x1db   : > { %3041 = vmatprep.subr.bf16.mxu1 %v3613_v0 }
 0x1de   : > { %3042 = vmatpush3.bf16.msra.mxu1 %v3277_v45 }
 0x1df   : > { %3043 = vmatprep.subr.bf16.mxu1 %v3613_v0 }
 0x1e2   : > { %3044 = vmatpush3.bf16.msra.mxu1 %v3278_v46 }
 0x1e3   : > { %3045 = vmatprep.subr.bf16.mxu1 %v3613_v0 }
 0x1e6   : > { %3046 = vmatpush3.bf16.msra.mxu1 %v3279_v47 }
 0x1e7   : > { %3047 = vmatprep.subr.bf16.mxu1 %v3613_v0 }
 0x1ea   : > { %3048 = vmatpush3.bf16.msra.mxu1 %v3280_v49  ;;  %v1523_v49 = vld [vmem:[%s1105_s22] sm:$0xff]  ;;  %s4167_s22 = sld [smem:[#allocation24_spill]] }
 0x1eb   : > { %1873 = vmatprep.subr.bf16.mxu1 %v3315_v18 }
 0x1ed   : > { %3050 = vmatmul.mubr.bf16.vlgmr.msra.gmra.mrb[4].mxu1 %v1551_v50 }
 0x1ee   : > { %1905 = vmatprep.mubr.bf16.mxu1 %v3615_v53  ;;  %1874 = vmatpush1.bf16.msra.mxu1 %v3313_v17  ;;  %v2854_v53 = vld [vmem:[%s4162_s10] ss:$0 sm:$0xff]  ;;  %s1136_s10 = scalar_lea.vmem %s3764_s20, %s3943_s0 }
 0x1ef   : > { %1875 = vmatprep.subr.bf16.mxu1 %v3318_v19 }
 0x1f2   : > { %1876 = vmatpush1.bf16.msra.mxu1 %v3316_v20 }
 0x1f3   : > { %1877 = vmatprep.subr.bf16.mxu1 %v3321_v21 }
 0x1f6   : > { %1878 = vmatpush1.bf16.msra.mxu1 %v3319_v22 }
 0x1f7   : > { %1879 = vmatprep.subr.bf16.mxu1 %v3324_v23 }
 0x1fa   : > { %1880 = vmatpush1.bf16.msra.mxu1 %v3322_v24 }
 0x1fb   : > { %1881 = vmatprep.subr.bf16.mxu1 %v3327_v25 }
 0x1fe   : > { %1882 = vmatpush1.bf16.msra.mxu1 %v3325_v26 }
 0x1ff   : > { %1883 = vmatprep.subr.bf16.mxu1 %v3330_v27 }
 0x202   : > { %1884 = vmatpush1.bf16.msra.mxu1 %v3328_v28 }
 0x203   : > { %1885 = vmatprep.subr.bf16.mxu1 %v3333_v29 }
 0x206   : > { %1886 = vmatpush1.bf16.msra.mxu1 %v3331_v30 }
 0x207   : > { %1887 = vmatprep.subr.bf16.mxu1 %v3336_v31  ;;  %v1916_v31 = vld [vmem:[%s1109_s23] sm:$0xff] }
 0x20a   : > { %1888 = vmatpush1.bf16.msra.mxu1 %v3334_v32 }
 0x20b   : > { %3093 = vmatprep.subr.bf16.mxu1 %v3613_v0 }
 0x2a0   : > { %v1366_v55 = vpop.f32.mrb[0].mxu1 }
 0x2a1   : > { %v1367_v56 = vadd.f32 %v2820_v54, %v1366_v55  ;;  %v3031_v57 = vpop.f32.mrb[1].mxu1 }
 0x2a2   : > { %v1369_v58 = vpop.f32.mrb[2].mxu1 }
 0x2a3   : > { %v1372_v59 = vmax.f32 %v1367_v56, 0.0  ;;  %v3032_v60 = vpop.f32.mrb[3].mxu1 }
 0x2a5   : > { %v1390_v62 = vpack.c.bf16 %v1372_v59, %v1372_v59 }
 0x2a7   : > { %1515 = vmatmul.mubr.bf16.vlgmr.msra.gmra.mrb[4].mxu0 %v1390_v62  ;;  %v3337_v62 = vld [vmem:[#allocation7] sm:$0xff]  }
 0x2a8   : > { %3054 = vmatpush3.bf16.msra.mxu0 %v3305_v61  ;;  %3069 = vmatprep.mubr.msk.bf16.mxu0 %vm3614_vm0, %v3613_v0 }
 0x2a9   : > { %3055 = vmatprep.subr.bf16.mxu0 %v3613_v0 }
 0x2ac   : > { %3056 = vmatpush3.bf16.msra.mxu0 %v3306_v63 }
 0x2ad   : > { %3057 = vmatprep.subr.bf16.mxu0 %v3613_v0 }
 0x2b0   : > { %3058 = vmatpush3.bf16.msra.mxu0 %v3307_v1  ;;  %v3338_v1 = vld [vmem:[#allocation7 + $0x8] sm:$0xff]  }
 0x2b1   : > { %3059 = vmatprep.subr.bf16.mxu0 %v3613_v0 }
 0x2b4   : > { %3060 = vmatpush3.bf16.msra.mxu0 %v3308_v2  ;;  %v3339_v2 = vld [vmem:[#allocation7 + $0x10] sm:$0xff]  }
 0x2b5   : > { %3061 = vmatprep.subr.bf16.mxu0 %v3613_v0 }
 0x2b8   : > { %3062 = vmatpush3.bf16.msra.mxu0 %v3309_v3  ;;  %v3340_v3 = vld [vmem:[#allocation7 + $0x18] sm:$0xff]  }
 0x2b9   : > { %3063 = vmatprep.subr.bf16.mxu0 %v3613_v0 }
 0x2bc   : > { %3064 = vmatpush3.bf16.msra.mxu0 %v3310_v4  ;;  %v3341_v4 = vld [vmem:[#allocation7 + $0x20] sm:$0xff]  }
 0x2bd   : > { %3065 = vmatprep.subr.bf16.mxu0 %v3613_v0 }
 0x2c0   : > { %v1640_v7 = vpop.f32.mrb[4].mxu1  ;;  %3066 = vmatpush3.bf16.msra.mxu0 %v3311_v5  ;;  %v3342_v5 = vld [vmem:[#allocation7 + $0x28] sm:$0xff]  }
 0x2c1   : > { %v1641_v9 = vadd.f32 %v2845_v6, %v1640_v7  ;;  %v3051_v10 = vpop.f32.mrb[5].mxu1  ;;  %3067 = vmatprep.subr.bf16.mxu0 %v3613_v0  ;;  %v3344_v7 = vld [vmem:[#allocation7 + $0x38] sm:$0xff]  }
 0x2c2   : > { %v1643_v11 = vpop.f32.mrb[6].mxu1  ;;  %v3347_v10 = vld [vmem:[#allocation6 + $0x10] sm:$0xff]  }
 0x2c3   : > { %v1644_v12 = vadd.f32 %v2845_v6, %v1643_v11  ;;  %v3052_v13 = vpop.f32.mrb[7].mxu1  ;;  %v1647_v14 = vmax.f32 %v1641_v9, 0.0  ;;  %v3343_v6 = vld [vmem:[#allocation7 + $0x30] sm:$0xff]   ;;  %v3346_v9 = vld [vmem:[#allocation6 + $0x8] sm:$0xff]   ;;  %v3348_v11 = vld [vmem:[#allocation6 + $0x18] sm:$0xff]  }
 0x2c4   : > { %3068 = vmatpush3.bf16.msra.mxu0 %v3312_v8  ;;  %v3350_v13 = vld [vmem:[#allocation6 + $0x28] sm:$0xff]  }
 0x2c5   : > { %v1648_v15 = vmax.f32 %v1644_v12, 0.0  ;;  %3073 = vmatprep.subr.bf16.mxu0 %v3613_v0  ;;  %v3349_v12 = vld [vmem:[#allocation6 + $0x20] sm:$0xff]  }
 0x2c7   : > { %v1666_v16 = vpack.c.bf16 %v1648_v15, %v1647_v14  ;;  %v3351_v14 = vld [vmem:[#allocation6 + $0x30] sm:$0xff]   ;;  %v3352_v15 = vld [vmem:[#allocation6 + $0x38] sm:$0xff]  }
 0x2c9   : > { %3070 = vmatmul.mubr.bf16.vlgmr.msra.gmra.mrb[8].mxu0 %v1666_v16  ;;  %v1780_v16 = vld [vmem:[%s4163_s28] sm:$0x3]  ;;  %s4169_s28 = sld [smem:[#allocation26_spill]] }
 0x2ca   : > { %3089 = vmatprep.mubr.msk.bf16.mxu0 %vm3614_vm0, %v3613_v0  ;;  %3074 = vmatpush3.bf16.msra.mxu0 %v3345_v33  ;;  %v1786_v17 = vrot.slane %v1780_v16, %v1394_v36  ;;  %v1790_v18 = vrot.slane %v1780_v16, %v1398_v38 }
 0x2cb   : > { %3075 = vmatprep.subr.bf16.mxu0 %v3613_v0 }
 0x2ce   : > { %3076 = vmatpush3.bf16.msra.mxu0 %v3346_v9 }
 0x2cf   : > { %3077 = vmatprep.subr.bf16.mxu0 %v3613_v0 }
 0x2d2   : > { %3078 = vmatpush3.bf16.msra.mxu0 %v3347_v10 }
 0x2d3   : > { %3079 = vmatprep.subr.bf16.mxu0 %v3613_v0 }
 0x2d6   : > { %3080 = vmatpush3.bf16.msra.mxu0 %v3348_v11 }
 0x2d7   : > { %3081 = vmatprep.subr.bf16.mxu0 %v3613_v0 }
 0x2da   : > { %3082 = vmatpush3.bf16.msra.mxu0 %v3349_v12 }
 0x2db   : > { %3083 = vmatprep.subr.bf16.mxu0 %v3613_v0 }
 0x2de   : > { %3084 = vmatpush3.bf16.msra.mxu0 %v3350_v13 }
 0x2df   : > { %3085 = vmatprep.subr.bf16.mxu0 %v3613_v0 }
 0x2e2   : > { %3086 = vmatpush3.bf16.msra.mxu0 %v3351_v14 }
 0x2e3   : > { %3087 = vmatprep.subr.bf16.mxu0 %v3613_v0 }
 0x2e6   : > { %3088 = vmatpush3.bf16.msra.mxu0 %v3352_v15 }
 0x2e7   : > { %3113 = vmatprep.subr.bf16.mxu0 %v3613_v0 }
 0x37a   : > { %v1516_v41 = vpop.f32.mrb[4].mxu0 }
 0x37b   : > { %v1517_v42 = vadd.f32 %v1516_v41, %v1395_v39  ;;  %v1518_v43 = vpop.f32.mrb[5].mxu0  ;;  %v3353_v39 = vld [vmem:[#allocation9] sm:$0xff]   ;;  %v3354_v41 = vld [vmem:[#allocation9 + $0x8] sm:$0xff]  }
 0x37c   : > { %v1519_v44 = vadd.f32 %v1518_v43, %v1399_v40  ;;  %v1520_v45 = vpop.f32.mrb[6].mxu0  ;;  %v3355_v43 = vld [vmem:[#allocation9 + $0x10] sm:$0xff]  }
 0x37d   : > { %1529 = vst [vmem:[%s1118_s26] sm:$0xff] %v1517_v42  ;;  %v1521_v46 = vpop.f32.mrb[7].mxu0 }
 0x37e   : > { %v1524_v47 = vmul.f32 0.5, %v1519_v44  ;;  %1530 = vst [vmem:[%s1118_s26 + $0x8] sm:$0xff] %v1519_v44  ;;  %s4166_s26 = sld [smem:[#allocation18_spill]] }
 0x380   : > { %v1525_v48 = vmul.f32 1.442695, %v1524_v47  ;;  %v3356_v47 = vld [vmem:[#allocation9 + $0x18] sm:$0xff]  }
 0x382   : > { %3369 = vpow2.f32 %v1525_v48  ;;  %v3357_v48 = vld [vmem:[#allocation9 + $0x20] sm:$0xff]  }
 0x384   : > { %s1113_s7 = scalar_lea.vmem %s4166_s26, %s3943_s0 }
 0x385   : > { %v1917_v33 = vld [vmem:[%s1113_s7] sm:$0xff] }
 0x38c   : > { %v3370_v50 = vpop.eup %3369 }
 0x38d   : > { %v1527_v51 = vmul.f32 %v3370_v50, %v1523_v49  ;;  %v3358_v49 = vld [vmem:[#allocation9 + $0x28] sm:$0xff]   ;;  %v3359_v50 = vld [vmem:[#allocation9 + $0x30] sm:$0xff]  }
 0x38f   : > { %v1528_v52 = vadd.f32 %v1527_v51, %v1517_v42  ;;  %v3360_v51 = vld [vmem:[#allocation9 + $0x38] sm:$0xff]  }
 0x391   : > { %1531 = vst [vmem:[%s1122_s8] sm:$0xff] %v1528_v52  ;;  %v2062_v8 = vpack.c.bf16 %v1528_v52, %v1528_v52  ;;  %v3361_v52 = vld [vmem:[#allocation10] sm:$0xff]   ;;  %s4168_s8 = sld [smem:[#allocation25_spill]] }
 0x39c   : > { %v1755_v54 = vpop.f32.mrb[8].mxu0 }
 0x39d   : > { %v1756_v55 = vadd.f32 %v2854_v53, %v1755_v54  ;;  %v3071_v56 = vpop.f32.mrb[9].mxu0  ;;  %v3363_v54 = vld [vmem:[#allocation10 + $0x10] sm:$0xff]  }
 0x39e   : > { %v1758_v57 = vpop.f32.mrb[10].mxu0  ;;  %v3365_v56 = vld [vmem:[#allocation10 + $0x20] sm:$0xff]  }
 0x39f   : > { %v1759_v58 = vadd.f32 %v2854_v53, %v1758_v57  ;;  %v3072_v59 = vpop.f32.mrb[11].mxu0  ;;  %v1762_v60 = vmax.f32 %v1756_v55, 0.0  ;;  %v3362_v53 = vld [vmem:[#allocation10 + $0x8] sm:$0xff]   ;;  %v3364_v55 = vld [vmem:[#allocation10 + $0x18] sm:$0xff]  }
 0x3a0   : > { %v3366_v57 = vld [vmem:[#allocation10 + $0x28] sm:$0xff]  }
 0x3a1   : > { %v1763_v61 = vmax.f32 %v1759_v58, 0.0  ;;  %v2879_v58 = vld [vmem:[%s4167_s22] ss:$0 sm:$0xff] }
 0x3a3   : > { %v1781_v63 = vpack.c.bf16 %v1763_v61, %v1762_v60 }
 0x3a5   : > { %1906 = vmatmul.mubr.bf16.vlgmr.msra.gmra.mrb[8].mxu1 %v1781_v63 }
 0x3a6   : > { %3094 = vmatpush3.bf16.msra.mxu1 %v3337_v62  ;;  %3109 = vmatprep.mubr.msk.bf16.mxu1 %vm3614_vm0, %v3613_v0 }
 0x3a7   : > { %3095 = vmatprep.subr.bf16.mxu1 %v3613_v0 }
 0x3aa   : > { %3096 = vmatpush3.bf16.msra.mxu1 %v3338_v1 }
 0x3ab   : > { %3097 = vmatprep.subr.bf16.mxu1 %v3613_v0 }
 0x3ae   : > { %3098 = vmatpush3.bf16.msra.mxu1 %v3339_v2 }
 0x3af   : > { %3099 = vmatprep.subr.bf16.mxu1 %v3613_v0 }
 0x3b2   : > { %3100 = vmatpush3.bf16.msra.mxu1 %v3340_v3 }
 0x3b3   : > { %3101 = vmatprep.subr.bf16.mxu1 %v3613_v0 }
 0x3b6   : > { %3102 = vmatpush3.bf16.msra.mxu1 %v3341_v4 }
 0x3b7   : > { %3103 = vmatprep.subr.bf16.mxu1 %v3613_v0 }
 0x3ba   : > { %3104 = vmatpush3.bf16.msra.mxu1 %v3342_v5 }
 0x3bb   : > { %3105 = vmatprep.subr.bf16.mxu1 %v3613_v0 }
 0x3be   : > { %3106 = vmatpush3.bf16.msra.mxu1 %v3343_v6  ;;  %v3367_v6 = vld [vmem:[#allocation10 + $0x30] sm:$0xff]  }
 0x3bf   : > { %3107 = vmatprep.subr.bf16.mxu1 %v3613_v0 }
 0x3c2   : > { %3108 = vmatpush3.bf16.msra.mxu1 %v3344_v7  ;;  %v3368_v7 = vld [vmem:[#allocation10 + $0x38] sm:$0xff]  }
 0x3c3   : > { %3133 = vmatprep.subr.bf16.mxu1 %v3613_v0 }
 0x3c5   : > { %3110 = vmatmul.mubr.bf16.vlgmr.msra.gmra.mrb[12].mxu1 %v2062_v8  ;;  %v2896_v8 = vld [vmem:[%s4168_s8] ss:$0 sm:$0xff] }
 0x3c6   : > { %3149 = vmatprep.mubr.msk.bf16.mxu1 %vm3614_vm0, %v3613_v0  ;;  %3134 = vmatpush3.bf16.msra.mxu1 %v3361_v52 }
 0x3c7   : > { %3135 = vmatprep.subr.bf16.mxu1 %v3613_v0 }
 0x3ca   : > { %3136 = vmatpush3.bf16.msra.mxu1 %v3362_v53 }
 0x3cb   : > { %3137 = vmatprep.subr.bf16.mxu1 %v3613_v0 }
 0x3ce   : > { %3138 = vmatpush3.bf16.msra.mxu1 %v3363_v54 }
 0x3cf   : > { %3139 = vmatprep.subr.bf16.mxu1 %v3613_v0 }
 0x3d2   : > { %3140 = vmatpush3.bf16.msra.mxu1 %v3364_v55 }
 0x3d3   : > { %3141 = vmatprep.subr.bf16.mxu1 %v3613_v0 }
 0x3d6   : > { %3142 = vmatpush3.bf16.msra.mxu1 %v3365_v56 }
 0x3d7   : > { %3143 = vmatprep.subr.bf16.mxu1 %v3613_v0 }
 0x3da   : > { %3144 = vmatpush3.bf16.msra.mxu1 %v3366_v57 }
 0x3db   : > { %3145 = vmatprep.subr.bf16.mxu1 %v3613_v0 }
 0x3de   : > { %3146 = vmatpush3.bf16.msra.mxu1 %v3367_v6 }
 0x3df   : > { %3147 = vmatprep.subr.bf16.mxu1 %v3613_v0 }
 0x3e2   : > { %3148 = vmatpush3.bf16.msra.mxu1 %v3368_v7 }
 0x478   : > { %v1907_v19 = vpop.f32.mrb[8].mxu1 }
 0x479   : > { %v1908_v20 = vadd.f32 %v1907_v19, %v1786_v17  ;;  %v1909_v21 = vpop.f32.mrb[9].mxu1 }
 0x47a   : > { %v1910_v22 = vadd.f32 %v1909_v21, %v1790_v18  ;;  %v1911_v23 = vpop.f32.mrb[10].mxu1 }
 0x47b   : > { %1928 = vst [vmem:[%s1127_s18] sm:$0xff] %v1908_v20  ;;  %v1912_v24 = vadd.f32 %v1911_v23, %v1786_v17  ;;  %v1913_v25 = vpop.f32.mrb[11].mxu1 }
 0x47c   : > { %v1918_v26 = vmul.f32 0.5, %v1910_v22  ;;  %1929 = vst [vmem:[%s1127_s18 + $0x8] sm:$0xff] %v1910_v22  ;;  %v1914_v27 = vadd.f32 %v1913_v25, %v1790_v18  ;;  %v2905_v18 = vld [vmem:[%s4169_s28] ss:$0 sm:$0xff]  ;;  %s1144_s18 = scalar_lea.vmem %s3774_s30, %s3943_s0 }
 0x47d   : > { %1930 = vst [vmem:[%s1132_s1] sm:$0xff] %v1912_v24 }
 0x47e   : > { %v1920_v28 = vmul.f32 1.442695, %v1918_v26  ;;  %v1919_v29 = vmul.f32 0.5, %v1914_v27  ;;  %1931 = vst [vmem:[%s1132_s1 + $0x8] sm:$0xff] %v1914_v27 }
 0x480   : > { %3371 = vpow2.f32 %v1920_v28  ;;  %v1922_v30 = vmul.f32 1.442695, %v1919_v29 }
 0x482   : > { %3373 = vpow2.f32 %v1922_v30 }
 0x48a   : > { %v3372_v32 = vpop.eup %3371 }
 0x48b   : > { %v1924_v34 = vmul.f32 %v3372_v32, %v1916_v31 }
 0x48c   : > { %v3374_v35 = vpop.eup %3373 }
 0x48d   : > { %v1925_v36 = vmul.f32 %v3374_v35, %v1917_v33  ;;  %v1926_v37 = vadd.f32 %v1924_v34, %v1908_v20 }
 0x48f   : > { %v1927_v38 = vadd.f32 %v1925_v36, %v1912_v24  ;;  %1932 = vst [vmem:[%s1136_s10] sm:$0xff] %v1926_v37 }
 0x491   : > { %v1966_v40 = vpack.c.bf16 %v1927_v38, %v1926_v37 }
 0x493   : > { %3090 = vmatmul.mubr.bf16.vlgmr.msra.gmra.mrb[12].mxu0 %v1966_v40 }
 0x494   : > { %3114 = vmatpush3.bf16.msra.mxu0 %v3353_v39  ;;  %3129 = vmatprep.mubr.msk.bf16.mxu0 %vm3614_vm0, %v3613_v0 }
 0x495   : > { %3115 = vmatprep.subr.bf16.mxu0 %v3613_v0 }
 0x498   : > { %v2145_v42 = vpop.f32.mrb[12].mxu1  ;;  %3116 = vmatpush3.bf16.msra.mxu0 %v3354_v41 }
 0x499   : > { %v3111_v44 = vpop.f32.mrb[13].mxu1  ;;  %3117 = vmatprep.subr.bf16.mxu0 %v3613_v0 }
 0x49a   : > { %v2148_v45 = vpop.f32.mrb[14].mxu1 }
 0x49b   : > { %v3112_v46 = vpop.f32.mrb[15].mxu1 }
 0x49c   : > { %3118 = vmatpush3.bf16.msra.mxu0 %v3355_v43 }
 0x49d   : > { %3119 = vmatprep.subr.bf16.mxu0 %v3613_v0 }
 0x4a0   : > { %3120 = vmatpush3.bf16.msra.mxu0 %v3356_v47 }
 0x4a1   : > { %3121 = vmatprep.subr.bf16.mxu0 %v3613_v0 }
 0x4a4   : > { %3122 = vmatpush3.bf16.msra.mxu0 %v3357_v48 }
 0x4a5   : > { %3123 = vmatprep.subr.bf16.mxu0 %v3613_v0 }
 0x4a8   : > { %3124 = vmatpush3.bf16.msra.mxu0 %v3358_v49 }
 0x4a9   : > { %3125 = vmatprep.subr.bf16.mxu0 %v3613_v0 }
 0x4ac   : > { %3126 = vmatpush3.bf16.msra.mxu0 %v3359_v50 }
 0x4ad   : > { %3127 = vmatprep.subr.bf16.mxu0 %v3613_v0 }
 0x4b0   : > { %3128 = vmatpush3.bf16.msra.mxu0 %v3360_v51 }
 0x566   : > { %v2055_v59 = vpop.f32.mrb[12].mxu0 }
 0x567   : > { %v2056_v60 = vadd.f32 %v2879_v58, %v2055_v59  ;;  %v3091_v61 = vpop.f32.mrb[13].mxu0 }
 0x568   : > { %v2058_v62 = vpop.f32.mrb[14].mxu0 }
 0x569   : > { %v2151_v63 = vadd.f32 %v2145_v42, %v2056_v60  ;;  %v2059_v1 = vadd.f32 %v2879_v58, %v2058_v62  ;;  %v3092_v2 = vpop.f32.mrb[15].mxu0 }
 0x56b   : > { %v2152_v3 = vmax.f32 %v2151_v63, 0.0  ;;  %v2153_v4 = vmax.f32 %v2059_v1, 0.0 }
 0x56d   : > { %v2171_v5 = vpack.c.bf16 %v2153_v4, %v2152_v3 }
 0x56f   : > { %3130 = vmatmul.mubr.bf16.vlgmr.msra.gmra.mrb[16].mxu0 %v2171_v5 }
 0x642   : > { %v2260_v9 = vpop.f32.mrb[16].mxu0 }
 0x643   : > { %v2261_v10 = vadd.f32 %v2896_v8, %v2260_v9  ;;  %v3131_v11 = vpop.f32.mrb[17].mxu0 }
 0x644   : > { %v2263_v12 = vpop.f32.mrb[18].mxu0 }
 0x645   : > { %v2264_v13 = vadd.f32 %v2896_v8, %v2263_v12  ;;  %v3132_v14 = vpop.f32.mrb[19].mxu0  ;;  %v2267_v15 = vmax.f32 %v2261_v10, 0.0 }
 0x647   : > { %v2268_v16 = vmax.f32 %v2264_v13, 0.0 }
 0x649   : > { %v2286_v17 = vpack.c.bf16 %v2268_v16, %v2267_v15 }
 0x64b   : > { %3150 = vmatmul.mubr.bf16.vlgmr.msra.gmra.mrb[16].mxu1 %v2286_v17 }
 0x71e   : > { %v2375_v19 = vpop.f32.mrb[16].mxu1 }
 0x71f   : > { %v2376_v20 = vadd.f32 %v2905_v18, %v2375_v19  ;;  %v3151_v21 = vpop.f32.mrb[17].mxu1 }
 0x720   : > { %v2378_v0 = vpop.f32.mrb[18].mxu1 }
 0x721   : > { %v2914_v22 = vmul.f32 -1.442695, %v2376_v20  ;;  %v2379_v23 = vadd.f32 %v2905_v18, %v2378_v0  ;;  %v3152_v24 = vpop.f32.mrb[19].mxu1 }
 0x723   : > { %3375 = vpow2.f32 %v2914_v22  ;;  %v2915_v25 = vmul.f32 -1.442695, %v2379_v23 }
 0x725   : > { %3377 = vpow2.f32 %v2915_v25 }
 0x72d   : > { %v3376_v26 = vpop.eup %3375 }
 0x72e   : > { %v2388_v27 = vadd.f32 1.0, %v3376_v26 }
 0x72f   : > { %v3378_v28 = vpop.eup %3377 }
 0x730   : > { %3379 = vrcp.f32 %v2388_v27  ;;  %v2389_v29 = vadd.f32 1.0, %v3378_v28 }
 0x732   : > { %3381 = vrcp.f32 %v2389_v29 }
 0x73a   : > { %v3380_v30 = vpop.eup %3379 }
 0x73b   : > { %2394 = vst [vmem:[%s1140_s16] sm:$0xff] %v3380_v30 }
 0x73c   : > { %v3382_v31 = vpop.eup %3381 }
 0x73d   : > { %2395 = vst [vmem:[%s1144_s18] sm:$0xff] %v3382_v31 }
 0x73e PF: > { %s76_s15 = sadd.s32 1, %s3573_s15  }
 0x73f   : > { %p73_p13 = scmp.ge.s32.totalorder %s76_s15, 4  }
 0x741   :  { %75 = sbr.rel (!%p73_p13) target bundleno = 50 (0x32), region = 285 }
 0x748   :  { %2505 = vsyncpa [#allocation3], 1 }
 0x749   :  { %2507 = vsyncpa [#allocation3 + $0x1], 1 }
 0x74a   :  { %2508 = vsyncpa [#allocation5], 1 }
 0x74b   :  { %2509 = vsyncpa [#allocation8], 1 }
 0x74c   :  { %2510 = vsyncpa [#allocation11], 1 }

</bundles_post_ra>
